<compile_context>
chip_gen: v6e
topology: v6e:2x2x1
jax: 0.10.0
libtpu: 0.0.40
codegen_flags: <defaults>
</compile_context>

<pallas_src>
import functools

import numpy as np
import jax
import jax.numpy as jnp
from jax.experimental import pallas as pl
from jax.experimental.pallas import tpu as pltpu

DIL = 4  # dilation / padding of the 3x3 convs (BAM default)


def bam_kernel(x_ref, pc_ref, pb_ref, masks_ref, out_ref,
               *, H, W, C, Bc, BN, mm_dtype):
    HW = H * W

    # ---- unpack the two parameter slabs (loaded once, reused for all b) ----
    pc = pc_ref[...]                                   # (C, 3*Bc + 2)
    wca1 = pc[:, 0:Bc]                                 # (C, Bc)  BN scale folded in
    wca2t = pc[:, Bc:2 * Bc]                           # (C, Bc)
    bca2 = pc[:, 2 * Bc:2 * Bc + 1]                    # (C, 1)
    ca_h = pc[0:1, 2 * Bc + 1:3 * Bc + 1]              # (1, Bc)  bias+BN shift folded
    br2 = pc[0:1, 3 * Bc + 1:3 * Bc + 2]               # (1, 1)

    pb = pb_ref[...]                                   # (Bc, C + 18*Bc + 4)
    o = 0
    wr1t = pb[:, o:o + C]; o += C                      # (Bc, C)   BN scale folded in
    wc1 = pb[:, o:o + 9 * Bc]; o += 9 * Bc             # (Bc, 9*Bc)
    wc2 = pb[:, o:o + 9 * Bc]; o += 9 * Bc             # (Bc, 9*Bc)
    wr2 = pb[:, o:o + 1]; o += 1                       # (Bc, 1)
    r1_h = pb[:, o:o + 1]; o += 1                      # (Bc, 1)
    c1_h = pb[:, o:o + 1]; o += 1                      # (Bc, 1)
    c2_h = pb[:, o:o + 1]; o += 1                      # (Bc, 1)

    masks = masks_ref[...]                             # (9*Bc, HW) tap validity

    # Matmul-operand dtype (f32 here; bf16 worthwhile on v6e/v7x at prod size).
    wr1t_m = wr1t.astype(mm_dtype)
    wc1_m = wc1.astype(mm_dtype)
    wc2_m = wc2.astype(mm_dtype)

    # Static circular-roll amounts per tap; the masks zero wrapped / OOB taps,
    # so a circular roll is exactly equivalent to the zero-padded shift.
    shifts = []
    for k in range(9):
        dh = (k // 3 - 1) * DIL
        dw = (k % 3 - 1) * DIL
        shifts.append((-(dh * W + dw)) % HW)

    def dilated_conv(t, wmat_m, bn_shift):
        # t: (Bc, HW) -> (Bc, HW).  3x3 conv, dilation=DIL, padding=DIL:
        # 9 in-register rolls (XLU) + one mask multiply + one MXU contraction.
        taps = [t if shifts[k] == 0 else pltpu.roll(t, shift=shifts[k], axis=1)
                for k in range(9)]
        tap_mat = jnp.concatenate(taps, axis=0) * masks              # (9*Bc, HW)
        y = jnp.dot(wmat_m, tap_mat.astype(mm_dtype),
                    preferred_element_type=jnp.float32)              # (Bc, HW)
        return jnp.maximum(y + bn_shift, 0.0)                        # BN(+bias) + ReLU

    for b in range(BN):
        x = x_ref[b]                                                 # (C, HW)

        # ---------------- channel attention (VPU / XLU only) ----------------
        avg = jnp.mean(x, axis=1, keepdims=True)                     # (C, 1)
        h = jnp.sum(avg * wca1, axis=0, keepdims=True)               # (1, Bc)
        h = jnp.maximum(h + ca_h, 0.0)                               # BN(+bias) + ReLU
        ca = jnp.sum(wca2t * h, axis=1, keepdims=True) + bca2        # (C, 1)

        # ---------------- spatial attention ----------------
        s1 = jnp.dot(wr1t_m, x.astype(mm_dtype),
                     preferred_element_type=jnp.float32)             # (Bc, HW)
        s1 = jnp.maximum(s1 + r1_h, 0.0)                             # BN(+bias) + ReLU
        t1 = dilated_conv(s1, wc1_m, c1_h)
        t2 = dilated_conv(t1, wc2_m, c2_h)
        sa = jnp.sum(t2 * wr2, axis=0, keepdims=True) + br2          # (1, HW)

        # ---------------- combine ----------------
        gate = jax.nn.sigmoid(ca * sa) + 1.0                         # (C, HW)
        out_ref[b] = gate * x                                        # lane-dense store


def make_masks(H, W, B):
    """Per-tap validity masks, pre-broadcast over bottleneck rows: (9*B, HW)."""
    m = np.zeros((9, H * W), np.float32)
    hh, ww = np.meshgrid(np.arange(H), np.arange(W), indexing='ij')
    for k in range(9):
        dh = (k // 3 - 1) * DIL
        dw = (k % 3 - 1) * DIL
        valid = (hh + dh >= 0) & (hh + dh < H) & (ww + dw >= 0) & (ww + dw < W)
        m[k] = valid.reshape(-1).astype(np.float32)
    return jnp.asarray(np.repeat(m, B, axis=0))        # rows ordered k*B + b_in


def prep_kernel_params(p, H, W):
    """Fold BN scales into weights / biases into shifts and pack into 3 slabs."""
    C, B = p['wca1'].shape
    f32 = jnp.float32

    # channel attention MLP
    wca1 = (p['wca1'] * p['sca']).astype(f32)                       # (C, B)
    ca_h = (p['bca1'] * p['sca'] + p['hca']).astype(f32)            # (1, B)
    wca2t = p['wca2'].T.astype(f32)                                 # (C, B)
    bca2 = p['bca2'].T.astype(f32)                                  # (C, 1)
    # spatial reduce_1
    wr1t = (p['wr1'] * p['sr1']).T.astype(f32)                      # (B, C)
    r1_h = (p['br1'] * p['sr1'] + p['hr1']).T.astype(f32)           # (B, 1)
    # dilated convs: columns indexed by k*B + b_in, rows = b_out, BN scale folded
    wc1 = (p['wc1_hwio'].reshape(9 * B, B).T * p['sc1'].T).astype(f32)   # (B, 9B)
    c1_h = (p['bc1'] * p['sc1'] + p['hc1']).T.astype(f32)           # (B, 1)
    wc2 = (p['wc2_hwio'].reshape(9 * B, B).T * p['sc2'].T).astype(f32)
    c2_h = (p['bc2'] * p['sc2'] + p['hc2']).T.astype(f32)
    # spatial reduce_2
    wr2 = p['wr2'].astype(f32)                                      # (B, 1)
    br2 = p['br2'].astype(f32)                                      # (1, 1)

    # slab_c: channel-oriented params; the (1, B)/(1, 1) rows live in row 0.
    slab_c = jnp.zeros((C, 3 * B + 2), f32)
    slab_c = slab_c.at[:, 0:B].set(wca1)
    slab_c = slab_c.at[:, B:2 * B].set(wca2t)
    slab_c = slab_c.at[:, 2 * B:2 * B + 1].set(bca2)
    slab_c = slab_c.at[0:1, 2 * B + 1:3 * B + 1].set(ca_h)
    slab_c = slab_c.at[0:1, 3 * B + 1:3 * B + 2].set(br2)

    # slab_b: bottleneck-oriented params.
    slab_b = jnp.concatenate([wr1t, wc1, wc2, wr2, r1_h, c1_h, c2_h], axis=1)

    masks = make_masks(H, W, B)                                     # (9B, HW)
    return slab_c, slab_b, masks


def _tensorcores_per_chip():
    """TensorCores per chip, via pltpu.get_tpu_info() with defensive fallbacks."""
    try:
        info = pltpu.get_tpu_info()
        for attr in ("num_cores", "tensorcores_per_chip", "cores_per_chip",
                     "num_tensorcores", "core_count"):
            v = getattr(info, attr, None)
            if isinstance(v, int) and v > 0:
                return v
    except Exception:
        pass
    try:
        kind = jax.devices()[0].device_kind.lower()
        if "v7" in kind:
            return 2
    except Exception:
        pass
    return 1


def bam_pallas(x_nchw, params, matmul_dtype=jnp.float32):
    N, C, H, W = x_nchw.shape
    HW = H * W
    Bc = params['wca1'].shape[1]
    slab_c, slab_b, masks = prep_kernel_params(params, H, W)
    x_flat = x_nchw.reshape(N, C, HW).astype(jnp.float32)   # channel-major, spatial on lanes

    # Generation-aware grid: parallel batch axis on multi-TC chips (v7x),
    # batch folded into one grid step on single-TC chips (v5e / v6e).
    if _tensorcores_per_chip() > 1 and N > 1:
        grid, bn, sem = (N,), 1, ("parallel",)
    else:
        grid, bn, sem = (1,), N, ("arbitrary",)

    out_flat = pl.pallas_call(
        functools.partial(bam_kernel, H=H, W=W, C=C, Bc=Bc, BN=bn,
                          mm_dtype=matmul_dtype),
        out_shape=jax.ShapeDtypeStruct((N, C, HW), jnp.float32),
        grid_spec=pltpu.PrefetchScalarGridSpec(
            num_scalar_prefetch=0,
            grid=grid,
            in_specs=[
                pl.BlockSpec((bn, C, HW), lambda n: (n, 0, 0)),
                pl.BlockSpec(slab_c.shape, lambda n: (0, 0)),
                pl.BlockSpec(slab_b.shape, lambda n: (0, 0)),
                pl.BlockSpec(masks.shape, lambda n: (0, 0)),
            ],
            out_specs=pl.BlockSpec((bn, C, HW), lambda n: (n, 0, 0)),
        ),
        compiler_params=pltpu.CompilerParams(dimension_semantics=sem),
    )(x_flat, slab_c, slab_b, masks)
    return out_flat.reshape(N, C, H, W)


def make_params(key, C, B, eps=1e-5):
    keys = iter(jax.random.split(key, 64))

    def nrm(shape, s=0.2):
        return s * jax.random.normal(next(keys), shape, dtype=jnp.float32)

    def bn(dim):
        gamma = 1.0 + 0.1 * jax.random.normal(next(keys), (1, dim), jnp.float32)
        beta = 0.1 * jax.random.normal(next(keys), (1, dim), jnp.float32)
        mean = 0.1 * jax.random.normal(next(keys), (1, dim), jnp.float32)
        var = 1.0 + 0.5 * jax.random.uniform(next(keys), (1, dim), dtype=jnp.float32)
        scale = gamma / jnp.sqrt(var + eps)
        shift = beta - mean * scale
        return scale, shift

    p = {}
    # channel attention: Conv1x1(C->B) + BN + ReLU + Conv1x1(B->C)
    p['wca1'], p['bca1'] = nrm((C, B)), nrm((1, B))
    p['sca'], p['hca'] = bn(B)
    p['wca2'], p['bca2'] = nrm((B, C)), nrm((1, C))
    # spatial reduce_1: Conv1x1(C->B) + BN + ReLU
    p['wr1'], p['br1'] = nrm((C, B)), nrm((1, B))
    p['sr1'], p['hr1'] = bn(B)
    # two dilated 3x3 convs (HWIO) + BN + ReLU
    p['wc1_hwio'], p['bc1'] = nrm((3, 3, B, B)), nrm((1, B))
    p['sc1'], p['hc1'] = bn(B)
    p['wc2_hwio'], p['bc2'] = nrm((3, 3, B, B)), nrm((1, B))
    p['sc2'], p['hc2'] = bn(B)
    # spatial reduce_2: Conv1x1(B->1)
    p['wr2'], p['br2'] = nrm((B, 1)), nrm((1, 1))
    return p


def bam_reference(x, p):
    """Pure-JAX (XLA) reference of the same forward pass, NHWC."""
    avg = jnp.mean(x, axis=(1, 2))                               # (N, C)
    h = avg @ p['wca1'] + p['bca1']
    h = jax.nn.relu(h * p['sca'] + p['hca'])
    ca = h @ p['wca2'] + p['bca2']                               # (N, C)

    s1 = jnp.einsum('nhwc,cb->nhwb', x, p['wr1']) + p['br1']
    s1 = jax.nn.relu(s1 * p['sr1'] + p['hr1'])

    def dconv(t, w, b, scale, shift):
        y = jax.lax.conv_general_dilated(
            t, w, window_strides=(1, 1),
            padding=((DIL, DIL), (DIL, DIL)), rhs_dilation=(DIL, DIL),
            dimension_numbers=('NHWC', 'HWIO', 'NHWC')) + b
        return jax.nn.relu(y * scale + shift)

    t1 = dconv(s1, p['wc1_hwio'], p['bc1'], p['sc1'], p['hc1'])
    t2 = dconv(t1, p['wc2_hwio'], p['bc2'], p['sc2'], p['hc2'])
    sa = jnp.einsum('nhwb,bo->nhwo', t2, p['wr2']) + p['br2']    # (N, H, W, 1)

    gate = jax.nn.sigmoid(ca[:, None, None, :] * sa) + 1.0
    return gate * x


if __name__ == "__main__":
    key = jax.random.PRNGKey(0)
    kx, kp = jax.random.split(key)

    # PyTorch-equivalent input: (N, C, H, W) = (2, 32, 16, 16); reduction=16 -> bottleneck B=2
    N, C, H, W = 2, 32, 16, 16
    B = C // 16

    x_nchw = jax.random.normal(kx, (N, C, H, W), dtype=jnp.float32)
    params = make_params(kp, C, B)

    out_nchw = jax.block_until_ready(bam_pallas(x_nchw, params))

    x_nhwc = jnp.transpose(x_nchw, (0, 2, 3, 1))
    ref_nchw = jnp.transpose(bam_reference(x_nhwc, params), (0, 3, 1, 2))

    assert out_nchw.shape == (N, C, H, W)
    max_err = float(jnp.max(jnp.abs(out_nchw - ref_nchw)))
    if not jnp.allclose(out_nchw, ref_nchw, atol=1e-4, rtol=1e-4):
        raise AssertionError(f"Pallas output mismatch vs reference, max abs err = {max_err}")

    print("KERNEL_OK")
</pallas_src>

<mosaic_0001>
module attributes {stable_mosaic.version = 11 : i64} {
  func.func @bam_kernel(%arg0: i32, %arg1: memref<2x32x256xf32, #tpu.memory_space<vmem>>, %arg2: memref<32x8xf32, #tpu.memory_space<vmem>>, %arg3: memref<2x72xf32, #tpu.memory_space<vmem>>, %arg4: memref<18x256xf32, #tpu.memory_space<vmem>>, %arg5: memref<2x32x256xf32, #tpu.memory_space<vmem>>) attributes {dimension_semantics = [#tpu.dimension_semantics<arbitrary>], iteration_bounds = array<i64: 1>, scalar_prefetch = 0 : i64, scratch_operands = 0 : i64, tpu.core_type = #tpu.core_type<tc>, window_params = [{transform_indices = @transform_0, window_bounds = array<i64: 2, 32, 256>}, {pipeline_mode = #tpu.pipeline_mode<synchronous>, transform_indices = @transform_1, window_bounds = array<i64: 32, 8>}, {pipeline_mode = #tpu.pipeline_mode<synchronous>, transform_indices = @transform_2, window_bounds = array<i64: 2, 72>}, {pipeline_mode = #tpu.pipeline_mode<synchronous>, transform_indices = @transform_3, window_bounds = array<i64: 18, 256>}, {transform_indices = @transform_4, window_bounds = array<i64: 2, 32, 256>}]} {
    %c0 = arith.constant 0 : index
    %c0_0 = arith.constant 0 : index
    %0 = vector.load %arg2[%c0, %c0_0] : memref<32x8xf32, #tpu.memory_space<vmem>>, vector<32x8xf32>
    %1 = vector.extract_strided_slice %0 {offsets = [0, 0], sizes = [32, 2], strides = [1, 1]} : vector<32x8xf32> to vector<32x2xf32>
    %2 = vector.extract_strided_slice %0 {offsets = [0, 2], sizes = [32, 2], strides = [1, 1]} : vector<32x8xf32> to vector<32x2xf32>
    %3 = vector.extract_strided_slice %0 {offsets = [0, 4], sizes = [32, 1], strides = [1, 1]} : vector<32x8xf32> to vector<32x1xf32>
    %4 = vector.extract_strided_slice %0 {offsets = [0, 5], sizes = [1, 2], strides = [1, 1]} : vector<32x8xf32> to vector<1x2xf32>
    %5 = vector.extract_strided_slice %0 {offsets = [0, 7], sizes = [1, 1], strides = [1, 1]} : vector<32x8xf32> to vector<1x1xf32>
    %c0_1 = arith.constant 0 : index
    %c0_2 = arith.constant 0 : index
    %6 = vector.load %arg3[%c0_1, %c0_2] : memref<2x72xf32, #tpu.memory_space<vmem>>, vector<2x72xf32>
    %7 = vector.extract_strided_slice %6 {offsets = [0, 0], sizes = [2, 32], strides = [1, 1]} : vector<2x72xf32> to vector<2x32xf32>
    %8 = vector.extract_strided_slice %6 {offsets = [0, 32], sizes = [2, 18], strides = [1, 1]} : vector<2x72xf32> to vector<2x18xf32>
    %9 = vector.extract_strided_slice %6 {offsets = [0, 50], sizes = [2, 18], strides = [1, 1]} : vector<2x72xf32> to vector<2x18xf32>
    %10 = vector.extract_strided_slice %6 {offsets = [0, 68], sizes = [2, 1], strides = [1, 1]} : vector<2x72xf32> to vector<2x1xf32>
    %11 = vector.extract_strided_slice %6 {offsets = [0, 69], sizes = [2, 1], strides = [1, 1]} : vector<2x72xf32> to vector<2x1xf32>
    %12 = vector.extract_strided_slice %6 {offsets = [0, 70], sizes = [2, 1], strides = [1, 1]} : vector<2x72xf32> to vector<2x1xf32>
    %13 = vector.extract_strided_slice %6 {offsets = [0, 71], sizes = [2, 1], strides = [1, 1]} : vector<2x72xf32> to vector<2x1xf32>
    %c0_3 = arith.constant 0 : index
    %c0_4 = arith.constant 0 : index
    %14 = vector.load %arg4[%c0_3, %c0_4] : memref<18x256xf32, #tpu.memory_space<vmem>>, vector<18x256xf32>
    %c0_5 = arith.constant 0 : index
    %c0_6 = arith.constant 0 : index
    %c0_7 = arith.constant 0 : index
    %15 = vector.load %arg1[%c0_5, %c0_6, %c0_7] : memref<2x32x256xf32, #tpu.memory_space<vmem>>, vector<1x32x256xf32>
    %16 = vector.shape_cast %15 : vector<1x32x256xf32> to vector<32x256xf32>
    %cst = arith.constant dense<0.000000e+00> : vector<32xf32>
    %17 = vector.multi_reduction <add>, %16, %cst [1] : vector<32x256xf32> to vector<32xf32>
    %18 = vector.shape_cast %17 : vector<32xf32> to vector<32x1xf32>
    %cst_8 = arith.constant 2.560000e+02 : f32
    %19 = vector.broadcast %cst_8 : f32 to vector<32x1xf32>
    %20 = arith.divf %18, %19 : vector<32x1xf32>
    %21 = vector.broadcast %20 : vector<32x1xf32> to vector<32x2xf32>
    %22 = arith.mulf %21, %1 : vector<32x2xf32>
    %cst_9 = arith.constant dense<0.000000e+00> : vector<2xf32>
    %23 = vector.multi_reduction <add>, %22, %cst_9 [0] : vector<32x2xf32> to vector<2xf32>
    %24 = vector.shape_cast %23 : vector<2xf32> to vector<1x2xf32>
    %25 = arith.addf %24, %4 : vector<1x2xf32>
    %cst_10 = arith.constant 0.000000e+00 : f32
    %26 = vector.broadcast %cst_10 : f32 to vector<1x2xf32>
    %27 = arith.maximumf %25, %26 : vector<1x2xf32>
    %28 = vector.broadcast %27 : vector<1x2xf32> to vector<32x2xf32>
    %29 = arith.mulf %2, %28 : vector<32x2xf32>
    %cst_11 = arith.constant dense<0.000000e+00> : vector<32xf32>
    %30 = vector.multi_reduction <add>, %29, %cst_11 [1] : vector<32x2xf32> to vector<32xf32>
    %31 = vector.shape_cast %30 : vector<32xf32> to vector<32x1xf32>
    %32 = arith.addf %31, %3 : vector<32x1xf32>
    %cst_12 = arith.constant dense<0.000000e+00> : vector<2x256xf32>
    %33 = tpu.matmul %7, %16, %cst_12 {dimension_numbers = #tpu.dot_dimension_numbers<[1], [0], [0], [1], [0, 0, 1, 1], [], []>} : vector<2x32xf32>, vector<32x256xf32>, vector<2x256xf32> -> vector<2x256xf32>
    %34 = vector.broadcast %11 : vector<2x1xf32> to vector<2x256xf32>
    %35 = arith.addf %33, %34 : vector<2x256xf32>
    %cst_13 = arith.constant 0.000000e+00 : f32
    %36 = vector.broadcast %cst_13 : f32 to vector<2x256xf32>
    %37 = arith.maximumf %35, %36 : vector<2x256xf32>
    %c68_i32 = arith.constant 68 : i32
    %38 = tpu.dynamic_rotate %37 by %c68_i32 dim 1 : vector<2x256xf32>, i32 -> vector<2x256xf32>
    %c64_i32 = arith.constant 64 : i32
    %39 = tpu.dynamic_rotate %37 by %c64_i32 dim 1 : vector<2x256xf32>, i32 -> vector<2x256xf32>
    %c60_i32 = arith.constant 60 : i32
    %40 = tpu.dynamic_rotate %37 by %c60_i32 dim 1 : vector<2x256xf32>, i32 -> vector<2x256xf32>
    %c4_i32 = arith.constant 4 : i32
    %41 = tpu.dynamic_rotate %37 by %c4_i32 dim 1 : vector<2x256xf32>, i32 -> vector<2x256xf32>
    %c252_i32 = arith.constant 252 : i32
    %42 = tpu.dynamic_rotate %37 by %c252_i32 dim 1 : vector<2x256xf32>, i32 -> vector<2x256xf32>
    %c196_i32 = arith.constant 196 : i32
    %43 = tpu.dynamic_rotate %37 by %c196_i32 dim 1 : vector<2x256xf32>, i32 -> vector<2x256xf32>
    %c192_i32 = arith.constant 192 : i32
    %44 = tpu.dynamic_rotate %37 by %c192_i32 dim 1 : vector<2x256xf32>, i32 -> vector<2x256xf32>
    %c188_i32 = arith.constant 188 : i32
    %45 = tpu.dynamic_rotate %37 by %c188_i32 dim 1 : vector<2x256xf32>, i32 -> vector<2x256xf32>
    %46 = tpu.concatenate %38, %39, %40, %41, %37, %42, %43, %44, %45 in 0 : vector<2x256xf32>, vector<2x256xf32>, vector<2x256xf32>, vector<2x256xf32>, vector<2x256xf32>, vector<2x256xf32>, vector<2x256xf32>, vector<2x256xf32>, vector<2x256xf32> -> vector<18x256xf32>
    %47 = arith.mulf %46, %14 : vector<18x256xf32>
    %cst_14 = arith.constant dense<0.000000e+00> : vector<2x256xf32>
    %48 = tpu.matmul %8, %47, %cst_14 {dimension_numbers = #tpu.dot_dimension_numbers<[1], [0], [0], [1], [0, 0, 1, 1], [], []>} : vector<2x18xf32>, vector<18x256xf32>, vector<2x256xf32> -> vector<2x256xf32>
    %49 = vector.broadcast %12 : vector<2x1xf32> to vector<2x256xf32>
    %50 = arith.addf %48, %49 : vector<2x256xf32>
    %cst_15 = arith.constant 0.000000e+00 : f32
    %51 = vector.broadcast %cst_15 : f32 to vector<2x256xf32>
    %52 = arith.maximumf %50, %51 : vector<2x256xf32>
    %c68_i32_16 = arith.constant 68 : i32
    %53 = tpu.dynamic_rotate %52 by %c68_i32_16 dim 1 : vector<2x256xf32>, i32 -> vector<2x256xf32>
    %c64_i32_17 = arith.constant 64 : i32
    %54 = tpu.dynamic_rotate %52 by %c64_i32_17 dim 1 : vector<2x256xf32>, i32 -> vector<2x256xf32>
    %c60_i32_18 = arith.constant 60 : i32
    %55 = tpu.dynamic_rotate %52 by %c60_i32_18 dim 1 : vector<2x256xf32>, i32 -> vector<2x256xf32>
    %c4_i32_19 = arith.constant 4 : i32
    %56 = tpu.dynamic_rotate %52 by %c4_i32_19 dim 1 : vector<2x256xf32>, i32 -> vector<2x256xf32>
    %c252_i32_20 = arith.constant 252 : i32
    %57 = tpu.dynamic_rotate %52 by %c252_i32_20 dim 1 : vector<2x256xf32>, i32 -> vector<2x256xf32>
    %c196_i32_21 = arith.constant 196 : i32
    %58 = tpu.dynamic_rotate %52 by %c196_i32_21 dim 1 : vector<2x256xf32>, i32 -> vector<2x256xf32>
    %c192_i32_22 = arith.constant 192 : i32
    %59 = tpu.dynamic_rotate %52 by %c192_i32_22 dim 1 : vector<2x256xf32>, i32 -> vector<2x256xf32>
    %c188_i32_23 = arith.constant 188 : i32
    %60 = tpu.dynamic_rotate %52 by %c188_i32_23 dim 1 : vector<2x256xf32>, i32 -> vector<2x256xf32>
    %61 = tpu.concatenate %53, %54, %55, %56, %52, %57, %58, %59, %60 in 0 : vector<2x256xf32>, vector<2x256xf32>, vector<2x256xf32>, vector<2x256xf32>, vector<2x256xf32>, vector<2x256xf32>, vector<2x256xf32>, vector<2x256xf32>, vector<2x256xf32> -> vector<18x256xf32>
    %62 = arith.mulf %61, %14 : vector<18x256xf32>
    %cst_24 = arith.constant dense<0.000000e+00> : vector<2x256xf32>
    %63 = tpu.matmul %9, %62, %cst_24 {dimension_numbers = #tpu.dot_dimension_numbers<[1], [0], [0], [1], [0, 0, 1, 1], [], []>} : vector<2x18xf32>, vector<18x256xf32>, vector<2x256xf32> -> vector<2x256xf32>
    %64 = vector.broadcast %13 : vector<2x1xf32> to vector<2x256xf32>
    %65 = arith.addf %63, %64 : vector<2x256xf32>
    %cst_25 = arith.constant 0.000000e+00 : f32
    %66 = vector.broadcast %cst_25 : f32 to vector<2x256xf32>
    %67 = arith.maximumf %65, %66 : vector<2x256xf32>
    %68 = vector.broadcast %10 : vector<2x1xf32> to vector<2x256xf32>
    %69 = arith.mulf %67, %68 : vector<2x256xf32>
    %cst_26 = arith.constant dense<0.000000e+00> : vector<256xf32>
    %70 = vector.multi_reduction <add>, %69, %cst_26 [0] : vector<2x256xf32> to vector<256xf32>
    %71 = vector.shape_cast %70 : vector<256xf32> to vector<1x256xf32>
    %72 = vector.broadcast %5 : vector<1x1xf32> to vector<1x256xf32>
    %73 = arith.addf %71, %72 : vector<1x256xf32>
    %74 = vector.broadcast %32 : vector<32x1xf32> to vector<32x256xf32>
    %75 = vector.broadcast %73 : vector<1x256xf32> to vector<32x256xf32>
    %76 = arith.mulf %74, %75 : vector<32x256xf32>
    %77 = arith.negf %76 : vector<32x256xf32>
    %78 = math.exp %77 : vector<32x256xf32>
    %cst_27 = arith.constant 1.000000e+00 : f32
    %79 = vector.broadcast %cst_27 : f32 to vector<32x256xf32>
    %80 = arith.addf %79, %78 : vector<32x256xf32>
    %81 = arith.divf %79, %80 : vector<32x256xf32>
    %cst_28 = arith.constant 1.000000e+00 : f32
    %82 = vector.broadcast %cst_28 : f32 to vector<32x256xf32>
    %83 = arith.addf %81, %82 : vector<32x256xf32>
    %84 = arith.mulf %83, %16 : vector<32x256xf32>
    %c0_29 = arith.constant 0 : index
    %c0_30 = arith.constant 0 : index
    %c0_31 = arith.constant 0 : index
    %85 = vector.load %arg5[%c0_29, %c0_30, %c0_31] : memref<2x32x256xf32, #tpu.memory_space<vmem>>, vector<1x32x256xf32>
    %86 = vector.shape_cast %85 : vector<1x32x256xf32> to vector<32x256xf32>
    %87 = vector.shape_cast %84 : vector<32x256xf32> to vector<1x32x256xf32>
    tpu.vector_store %arg5[%c0_29, %c0_30, %c0_31], %87 {strides = array<i32>} : memref<2x32x256xf32, #tpu.memory_space<vmem>>, vector<1x32x256xf32>,
    %c1 = arith.constant 1 : index
    %c0_32 = arith.constant 0 : index
    %c0_33 = arith.constant 0 : index
    %88 = vector.load %arg1[%c1, %c0_32, %c0_33] : memref<2x32x256xf32, #tpu.memory_space<vmem>>, vector<1x32x256xf32>
    %89 = vector.shape_cast %88 : vector<1x32x256xf32> to vector<32x256xf32>
    %cst_34 = arith.constant dense<0.000000e+00> : vector<32xf32>
    %90 = vector.multi_reduction <add>, %89, %cst_34 [1] : vector<32x256xf32> to vector<32xf32>
    %91 = vector.shape_cast %90 : vector<32xf32> to vector<32x1xf32>
    %cst_35 = arith.constant 2.560000e+02 : f32
    %92 = vector.broadcast %cst_35 : f32 to vector<32x1xf32>
    %93 = arith.divf %91, %92 : vector<32x1xf32>
    %94 = vector.broadcast %93 : vector<32x1xf32> to vector<32x2xf32>
    %95 = arith.mulf %94, %1 : vector<32x2xf32>
    %cst_36 = arith.constant dense<0.000000e+00> : vector<2xf32>
    %96 = vector.multi_reduction <add>, %95, %cst_36 [0] : vector<32x2xf32> to vector<2xf32>
    %97 = vector.shape_cast %96 : vector<2xf32> to vector<1x2xf32>
    %98 = arith.addf %97, %4 : vector<1x2xf32>
    %cst_37 = arith.constant 0.000000e+00 : f32
    %99 = vector.broadcast %cst_37 : f32 to vector<1x2xf32>
    %100 = arith.maximumf %98, %99 : vector<1x2xf32>
    %101 = vector.broadcast %100 : vector<1x2xf32> to vector<32x2xf32>
    %102 = arith.mulf %2, %101 : vector<32x2xf32>
    %cst_38 = arith.constant dense<0.000000e+00> : vector<32xf32>
    %103 = vector.multi_reduction <add>, %102, %cst_38 [1] : vector<32x2xf32> to vector<32xf32>
    %104 = vector.shape_cast %103 : vector<32xf32> to vector<32x1xf32>
    %105 = arith.addf %104, %3 : vector<32x1xf32>
    %cst_39 = arith.constant dense<0.000000e+00> : vector<2x256xf32>
    %106 = tpu.matmul %7, %89, %cst_39 {dimension_numbers = #tpu.dot_dimension_numbers<[1], [0], [0], [1], [0, 0, 1, 1], [], []>} : vector<2x32xf32>, vector<32x256xf32>, vector<2x256xf32> -> vector<2x256xf32>
    %107 = vector.broadcast %11 : vector<2x1xf32> to vector<2x256xf32>
    %108 = arith.addf %106, %107 : vector<2x256xf32>
    %cst_40 = arith.constant 0.000000e+00 : f32
    %109 = vector.broadcast %cst_40 : f32 to vector<2x256xf32>
    %110 = arith.maximumf %108, %109 : vector<2x256xf32>
    %c68_i32_41 = arith.constant 68 : i32
    %111 = tpu.dynamic_rotate %110 by %c68_i32_41 dim 1 : vector<2x256xf32>, i32 -> vector<2x256xf32>
    %c64_i32_42 = arith.constant 64 : i32
    %112 = tpu.dynamic_rotate %110 by %c64_i32_42 dim 1 : vector<2x256xf32>, i32 -> vector<2x256xf32>
    %c60_i32_43 = arith.constant 60 : i32
    %113 = tpu.dynamic_rotate %110 by %c60_i32_43 dim 1 : vector<2x256xf32>, i32 -> vector<2x256xf32>
    %c4_i32_44 = arith.constant 4 : i32
    %114 = tpu.dynamic_rotate %110 by %c4_i32_44 dim 1 : vector<2x256xf32>, i32 -> vector<2x256xf32>
    %c252_i32_45 = arith.constant 252 : i32
    %115 = tpu.dynamic_rotate %110 by %c252_i32_45 dim 1 : vector<2x256xf32>, i32 -> vector<2x256xf32>
    %c196_i32_46 = arith.constant 196 : i32
    %116 = tpu.dynamic_rotate %110 by %c196_i32_46 dim 1 : vector<2x256xf32>, i32 -> vector<2x256xf32>
    %c192_i32_47 = arith.constant 192 : i32
    %117 = tpu.dynamic_rotate %110 by %c192_i32_47 dim 1 : vector<2x256xf32>, i32 -> vector<2x256xf32>
    %c188_i32_48 = arith.constant 188 : i32
    %118 = tpu.dynamic_rotate %110 by %c188_i32_48 dim 1 : vector<2x256xf32>, i32 -> vector<2x256xf32>
    %119 = tpu.concatenate %111, %112, %113, %114, %110, %115, %116, %117, %118 in 0 : vector<2x256xf32>, vector<2x256xf32>, vector<2x256xf32>, vector<2x256xf32>, vector<2x256xf32>, vector<2x256xf32>, vector<2x256xf32>, vector<2x256xf32>, vector<2x256xf32> -> vector<18x256xf32>
    %120 = arith.mulf %119, %14 : vector<18x256xf32>
    %cst_49 = arith.constant dense<0.000000e+00> : vector<2x256xf32>
    %121 = tpu.matmul %8, %120, %cst_49 {dimension_numbers = #tpu.dot_dimension_numbers<[1], [0], [0], [1], [0, 0, 1, 1], [], []>} : vector<2x18xf32>, vector<18x256xf32>, vector<2x256xf32> -> vector<2x256xf32>
    %122 = vector.broadcast %12 : vector<2x1xf32> to vector<2x256xf32>
    %123 = arith.addf %121, %122 : vector<2x256xf32>
    %cst_50 = arith.constant 0.000000e+00 : f32
    %124 = vector.broadcast %cst_50 : f32 to vector<2x256xf32>
    %125 = arith.maximumf %123, %124 : vector<2x256xf32>
    %c68_i32_51 = arith.constant 68 : i32
    %126 = tpu.dynamic_rotate %125 by %c68_i32_51 dim 1 : vector<2x256xf32>, i32 -> vector<2x256xf32>
    %c64_i32_52 = arith.constant 64 : i32
    %127 = tpu.dynamic_rotate %125 by %c64_i32_52 dim 1 : vector<2x256xf32>, i32 -> vector<2x256xf32>
    %c60_i32_53 = arith.constant 60 : i32
    %128 = tpu.dynamic_rotate %125 by %c60_i32_53 dim 1 : vector<2x256xf32>, i32 -> vector<2x256xf32>
    %c4_i32_54 = arith.constant 4 : i32
    %129 = tpu.dynamic_rotate %125 by %c4_i32_54 dim 1 : vector<2x256xf32>, i32 -> vector<2x256xf32>
    %c252_i32_55 = arith.constant 252 : i32
    %130 = tpu.dynamic_rotate %125 by %c252_i32_55 dim 1 : vector<2x256xf32>, i32 -> vector<2x256xf32>
    %c196_i32_56 = arith.constant 196 : i32
    %131 = tpu.dynamic_rotate %125 by %c196_i32_56 dim 1 : vector<2x256xf32>, i32 -> vector<2x256xf32>
    %c192_i32_57 = arith.constant 192 : i32
    %132 = tpu.dynamic_rotate %125 by %c192_i32_57 dim 1 : vector<2x256xf32>, i32 -> vector<2x256xf32>
    %c188_i32_58 = arith.constant 188 : i32
    %133 = tpu.dynamic_rotate %125 by %c188_i32_58 dim 1 : vector<2x256xf32>, i32 -> vector<2x256xf32>
    %134 = tpu.concatenate %126, %127, %128, %129, %125, %130, %131, %132, %133 in 0 : vector<2x256xf32>, vector<2x256xf32>, vector<2x256xf32>, vector<2x256xf32>, vector<2x256xf32>, vector<2x256xf32>, vector<2x256xf32>, vector<2x256xf32>, vector<2x256xf32> -> vector<18x256xf32>
    %135 = arith.mulf %134, %14 : vector<18x256xf32>
    %cst_59 = arith.constant dense<0.000000e+00> : vector<2x256xf32>
    %136 = tpu.matmul %9, %135, %cst_59 {dimension_numbers = #tpu.dot_dimension_numbers<[1], [0], [0], [1], [0, 0, 1, 1], [], []>} : vector<2x18xf32>, vector<18x256xf32>, vector<2x256xf32> -> vector<2x256xf32>
    %137 = vector.broadcast %13 : vector<2x1xf32> to vector<2x256xf32>
    %138 = arith.addf %136, %137 : vector<2x256xf32>
    %cst_60 = arith.constant 0.000000e+00 : f32
    %139 = vector.broadcast %cst_60 : f32 to vector<2x256xf32>
    %140 = arith.maximumf %138, %139 : vector<2x256xf32>
    %141 = vector.broadcast %10 : vector<2x1xf32> to vector<2x256xf32>
    %142 = arith.mulf %140, %141 : vector<2x256xf32>
    %cst_61 = arith.constant dense<0.000000e+00> : vector<256xf32>
    %143 = vector.multi_reduction <add>, %142, %cst_61 [0] : vector<2x256xf32> to vector<256xf32>
    %144 = vector.shape_cast %143 : vector<256xf32> to vector<1x256xf32>
    %145 = vector.broadcast %5 : vector<1x1xf32> to vector<1x256xf32>
    %146 = arith.addf %144, %145 : vector<1x256xf32>
    %147 = vector.broadcast %105 : vector<32x1xf32> to vector<32x256xf32>
    %148 = vector.broadcast %146 : vector<1x256xf32> to vector<32x256xf32>
    %149 = arith.mulf %147, %148 : vector<32x256xf32>
    %150 = arith.negf %149 : vector<32x256xf32>
    %151 = math.exp %150 : vector<32x256xf32>
    %cst_62 = arith.constant 1.000000e+00 : f32
    %152 = vector.broadcast %cst_62 : f32 to vector<32x256xf32>
    %153 = arith.addf %152, %151 : vector<32x256xf32>
    %154 = arith.divf %152, %153 : vector<32x256xf32>
    %cst_63 = arith.constant 1.000000e+00 : f32
    %155 = vector.broadcast %cst_63 : f32 to vector<32x256xf32>
    %156 = arith.addf %154, %155 : vector<32x256xf32>
    %157 = arith.mulf %156, %89 : vector<32x256xf32>
    %c1_64 = arith.constant 1 : index
    %c0_65 = arith.constant 0 : index
    %c0_66 = arith.constant 0 : index
    %158 = vector.load %arg5[%c1_64, %c0_65, %c0_66] : memref<2x32x256xf32, #tpu.memory_space<vmem>>, vector<1x32x256xf32>
    %159 = vector.shape_cast %158 : vector<1x32x256xf32> to vector<32x256xf32>
    %160 = vector.shape_cast %157 : vector<32x256xf32> to vector<1x32x256xf32>
    tpu.vector_store %arg5[%c1_64, %c0_65, %c0_66], %160 {strides = array<i32>} : memref<2x32x256xf32, #tpu.memory_space<vmem>>, vector<1x32x256xf32>,
    return
  }
  func.func @transform_0(%arg0: i32) -> (i32, i32, i32) {
    %c0_i32 = arith.constant 0 : i32
    %c0_i32_0 = arith.constant 0 : i32
    %c0_i32_1 = arith.constant 0 : i32
    return %arg0, %c0_i32, %c0_i32_0 : i32, i32, i32
  }
  func.func @transform_1(%arg0: i32) -> (i32, i32) {
    %c0_i32 = arith.constant 0 : i32
    %c0_i32_0 = arith.constant 0 : i32
    %c0_i32_1 = arith.constant 0 : i32
    return %c0_i32, %c0_i32_0 : i32, i32
  }
  func.func @transform_2(%arg0: i32) -> (i32, i32) {
    %c0_i32 = arith.constant 0 : i32
    %c0_i32_0 = arith.constant 0 : i32
    %c0_i32_1 = arith.constant 0 : i32
    return %c0_i32, %c0_i32_0 : i32, i32
  }
  func.func @transform_3(%arg0: i32) -> (i32, i32) {
    %c0_i32 = arith.constant 0 : i32
    %c0_i32_0 = arith.constant 0 : i32
    %c0_i32_1 = arith.constant 0 : i32
    return %c0_i32, %c0_i32_0 : i32, i32
  }
  func.func @transform_4(%arg0: i32) -> (i32, i32, i32) {
    %c0_i32 = arith.constant 0 : i32
    %c0_i32_0 = arith.constant 0 : i32
    %c0_i32_1 = arith.constant 0 : i32
    return %arg0, %c0_i32, %c0_i32_0 : i32, i32, i32
  }
}

</mosaic_0001>

<bundles_post_ra>
// kernel: tpu_custom_call.1
= control target key start
LH: loop header
LB: loop body
LE: loop exit
PB: predicated region body
PF: predicated region fallthrough
CT: control target
= control target key end

     0   :  { %9 = vsyncpa [#allocation3], 0  ;;  %s2076_s0 = inlined_call_operand.hbm [shape: f32[2,32,256], index: 0, kind: input, shape index: {}]   ;;  %s2077_s1 = inlined_call_operand.vmem [shape: f32[32,8], index: 1, kind: input, shape index: {}]   ;;  %s2078_s2 = inlined_call_operand.vmem [shape: f32[2,72], index: 2, kind: input, shape index: {}]   ;;  %s2079_s3 = inlined_call_operand.hbm [shape: f32[18,256], index: 3, kind: input, shape index: {}]   ;;  %s2080_s4 = inlined_call_operand.hbm [shape: f32[2,32,256], index: 4, kind: output, shape index: {}]  }
   0x1   :  { %10 = vsyncpa [#allocation6], 0 }
   0x2   :  { %11 = vsyncpa [#allocation4], 0  ;;  %s1547_s15 = smov [#allocation2]  }
   0x3   :  { %s17_s16 = sshll.u32 %s1547_s15, 4  ;;  %s18_s16 = int_to_ptr.vmem [resolvable:$true] %s17_s16 }
   0x4   :  { %s1489_s17 = scalar_lea.vmem %s18_s16, 2048  ;;  %p1494_p1 = scmp.lt.s32.totalorder %s18_s16, %s18_s16 }
   0x5   :  { %p1490_p0 = scmp.ne.s32.totalorder %s18_s16, %s1489_s17  ;;  %p1495_p2 = scmp.lt.s32.totalorder %s1489_s17, %s1489_s17 }
   0x7   :  { %p1496_p3 = por %p1495_p2, %p1494_p1 }
   0x9   :  { %p1497_p4 = pnand %p1496_p3, %p1490_p0 }
   0xb   :  { %1500 = shalt.err (!%p1497_p4)
}
   0xc   :  { %s1548_s18 = smov 256   ;;  %s1549_s19 = smov 16  }
   0xd   :  { %23 = dma.hbm_to_vmem [thread:$0]  %s2076_s0, 2048, %s18_s16, [#allocation3], %s1548_s18, %s1548_s18, %s1549_s19  }
   0xe   :  { %s1550_s22 = smov [#allocation5]  }
   0xf   :  { %s33_s23 = sshll.u32 %s1550_s22, 4  ;;  %s34_s23 = int_to_ptr.vmem [resolvable:$true] %s33_s23 }
  0x10   :  { %s1509_s24 = scalar_lea.vmem %s34_s23, 768  ;;  %p1514_p6 = scmp.lt.s32.totalorder %s34_s23, %s34_s23 }
  0x11   :  { %p1510_p5 = scmp.ne.s32.totalorder %s34_s23, %s1509_s24  ;;  %p1515_p7 = scmp.lt.s32.totalorder %s1509_s24, %s1509_s24 }
  0x13   :  { %p1516_p8 = por %p1515_p7, %p1514_p6 }
  0x15   :  { %p1517_p9 = pnand %p1516_p8, %p1510_p5 }
  0x17   :  { %1520 = shalt.err (!%p1517_p9)
}
  0x18   :  { %39 = dma.hbm_to_vmem [thread:$0]  %s2079_s3, 768, %s34_s23, [#allocation6], %s1548_s18, %s1548_s18, %s1549_s19  }
  0x19   :  { %1541 = dma.done.wait [#allocation3], 2048  }
  0x1a   :  { %1542 = vsyncadd [#allocation3], 4294965248 }
  0x1b   :  { %1543 = dma.done.wait [#allocation6], 768  }
  0x1c   :  { %1544 = vsyncadd [#allocation6], 4294966528  ;;  %v1551_v0 = vmov 0.0   ;;  %v1552_v1 = vmov 69   ;;  %v1608_v2 = vld [vmem:[#allocation2 + $0x38] sm:$0xff]  ;;  %v1610_v3 = vld [vmem:[#allocation2 + $0x30] sm:$0xff]  ;;  %v106_v33 = vlaneseq }
  0x1d   :  { %222 = vmatprep.mubr.f32.mxu0 %v1551_v0  ;;  %1394 = vset.pattern.permute.xlu0 %v1552_v1  ;;  %v1612_v4 = vld [vmem:[#allocation2 + $0x28] sm:$0xff]  ;;  %v1615_v5 = vld [vmem:[#allocation2 + $0x20] sm:$0xff]  ;;  %v1618_v6 = vld [vmem:[#allocation2 + $0x18] sm:$0xff]  ;;  %vm155_vm0 = vcmask 261120   ;;  %v1553_v19 = vmov 70   ;;  %s1555_s27 = smov 124  }
  0x1e   :  { %402 = vmatprep.mubr.f32.mxu1 %v1551_v0  ;;  %182 = vmatprep.subr.mxu0 %v1608_v2  ;;  %v1623_v7 = vld [vmem:[%s2078_s2] sm:$0x3]  ;;  %v1626_v8 = vld [vmem:[#allocation2 + $0x10] sm:$0xff]  ;;  %v1630_v9 = vld [vmem:[#allocation2 + $0x8] sm:$0xff]  ;;  %s1554_s2 = smov 68   ;;  %s1556_s28 = smov 64  }
  0x1f   :  { %183 = vmatpush1.msra.mxu0 %v1610_v3  ;;  %152 = vperm.xlu0 %1394, %v1623_v7   ;;  %v1633_v10 = vld [vmem:[#allocation2] sm:$0xff]  ;;  %v1636_v11 = vld [vmem:[#allocation2 + $0x78] sm:$0xff]  ;;  %v1639_v12 = vld [vmem:[#allocation2 + $0x70] sm:$0xff]  ;;  %s1557_s29 = smov 60   ;;  %s1558_s30 = smov 4   ;;  %v1711_v36 = vand.u32 127, %v106_v33 }
  0x20   :  { %184 = vmatprep.subr.mxu0 %v1612_v4  ;;  %v1642_v13 = vld [vmem:[#allocation2 + $0x68] sm:$0xff]  ;;  %v1647_v14 = vld [vmem:[#allocation2 + $0x60] sm:$0xff]  ;;  %v1650_v15 = vld [vmem:[#allocation2 + $0x58] sm:$0xff]  ;;  %s1559_s5 = smov 96   ;;  %vm302_vm5 = vcmask 1041408   ;;  %vm305_vm7 = vcmask 1043456  }
  0x21   :  { %185 = vmatpush1.msra.mxu0 %v1615_v5  ;;  %v1654_v16 = vld [vmem:[#allocation2 + $0x50] sm:$0xff]  ;;  %v1657_v17 = vld [vmem:[#allocation2 + $0x48] sm:$0xff]  ;;  %v1660_v18 = vld [vmem:[#allocation2 + $0x40] sm:$0xff]  ;;  %vm237_vm1 = vcmp.lt.s32.totalorder %v1711_v36, 68  ;;  %vm244_vm2 = vcmp.lt.s32.totalorder %v1711_v36, 64  ;;  %vm265_vm3 = vcmp.lt.s32.totalorder %v1711_v36, 124 }
  0x22   :  { %186 = vmatprep.subr.mxu0 %v1618_v6  ;;  %vm251_vm4 = vcmp.lt.s32.totalorder %v1711_v36, 60  ;;  %v1725_v45 = vld [vmem:[#allocation5 + $0x20] sm:$0x3]  ;;  %vm258_vm6 = vcmp.lt.s32.totalorder %v1711_v36, 4  ;;  %vm308_vm8 = vcmask 1045504   ;;  %vm329_vm9 = vcmask 146432  }
  0x23   :  { %187 = vmatpush1.msra.mxu0 %v1626_v8  ;;  %1395 = vset.pattern.permute.xlu0 %v1553_v19  ;;  %v1728_v52 = vld [vmem:[#allocation5 + $0x28] sm:$0x3]  ;;  %s1560_s6 = smov 78   ;;  %s1561_s9 = smov 123   ;;  %vm86_vm10 = vcmask 15360  }
  0x24   :  { %188 = vmatprep.subr.mxu0 %v1630_v9  ;;  %s1563_s16 = smov 126   ;;  %s1568_s17 = smov [#allocation7]  }
  0x25   :  { %189 = vmatpush1.msra.mxu0 %v1633_v10  ;;  %s1329_s20 = sshll.u32 %s1568_s17, 4  ;;  %s1330_s20 = int_to_ptr.vmem [resolvable:$true] %s1329_s20 }
  0x26   :  { %1342 = vmatmul.mubr.msk.f32.vlgmr.msra.gmra.mxu0 %vm155_vm0, %v1623_v7  ;;  %826 = vmatprep.subr.mxu0 %v1636_v11  ;;  %s1521_s21 = scalar_lea.vmem %s1330_s20, 2048  ;;  %p1526_p11 = scmp.lt.s32.totalorder %s1330_s20, %s1330_s20 }
  0x27   :  { %827 = vmatpush1.msra.mxu0 %v1639_v12  ;;  %866 = vmatprep.mubr.f32.mxu0 %v1551_v0  ;;  %p1522_p10 = scmp.ne.s32.totalorder %s1330_s20, %s1521_s21  ;;  %p1527_p12 = scmp.lt.s32.totalorder %s1521_s21, %s1521_s21 }
  0x28   :  { %828 = vmatprep.subr.mxu0 %v1642_v13 }
  0x29   :  { %829 = vmatpush1.msra.mxu0 %v1647_v14  ;;  %p1528_p13 = por %p1527_p12, %p1526_p11 }
  0x2a   :  { %830 = vmatprep.subr.mxu0 %v1650_v15 }
  0x2b   :  { %831 = vmatpush1.msra.mxu0 %v1654_v16  ;;  %p1529_p0 = pnand %p1528_p13, %p1522_p10 }
  0x2c   :  { %832 = vmatprep.subr.mxu0 %v1657_v17 }
  0x2d   :  { %833 = vmatpush1.msra.mxu0 %v1660_v18 }
  0x2e   :  { %1357 = vmatmul.mubr.msk.f32.vlgmr.msra.gmra.mxu0 %vm155_vm0, %v1623_v7 }
  0x2f   :  { %1188 = vmatprep.mubr.f32.mxu0 %v1551_v0 }
  0x9a   :  { %v153_v20 = vpop.permute.xlu0 %152 }
  0xe6   :  { %v224_v21 = vpop.f32.mrf.mxu0 }
  0xe7   :  { %v225_v22 = vadd.f32 %v224_v21, %v153_v20 }
  0xe8   :  { %v226_v23 = vpop.f32.mrf.mxu0 }
  0xe9   :  { %v1668_v24 = vmax.f32 %v225_v22, 0.0  ;;  %v227_v25 = vadd.f32 %v226_v23, %v153_v20 }
  0xeb   :  { %231 = vrot.lane.b32.xlu1 %v1668_v24, %s1554_s2  ;;  %261 = vrot.lane.b32.xlu0 %v1668_v24, %s1555_s27  ;;  %v1674_v26 = vmax.f32 %v227_v25, 0.0 }
  0xee   :  { %v868_v27 = vpop.f32.mrf.mxu0 }
  0xef   :  { %240 = vrot.lane.b32.xlu1 %v1668_v24, %s1556_s28  ;;  %233 = vrot.lane.b32.xlu0 %v1674_v26, %s1554_s2  ;;  %v869_v29 = vadd.f32 %v868_v27, %v153_v20  ;;  %v1746_v27 = vld [vmem:[#allocation5 + $0x18] sm:$0xff] }
  0xf0   :  { %v870_v28 = vpop.f32.mrf.mxu0 }
  0xf1   :  { %v871_v30 = vadd.f32 %v870_v28, %v153_v20  ;;  %v1694_v31 = vmax.f32 %v869_v29, 0.0  ;;  %v1748_v28 = vld [vmem:[#allocation5 + $0x10] sm:$0xff] }
  0xf3   :  { %247 = vrot.lane.b32.xlu1 %v1668_v24, %s1557_s29  ;;  %242 = vrot.lane.b32.xlu0 %v1674_v26, %s1556_s28  ;;  %v1696_v32 = vmax.f32 %v871_v30, 0.0 }
  0xf7   :  { %263 = vrot.lane.b32.xlu1 %v1674_v26, %s1555_s27  ;;  %249 = vrot.lane.b32.xlu0 %v1674_v26, %s1557_s29 }
  0xfb   :  { %254 = vrot.lane.b32.xlu1 %v1668_v24, %s1558_s30  ;;  %256 = vrot.lane.b32.xlu0 %v1674_v26, %s1558_s30 }
  0xff   :  { %327 = vrot.lane.b32.xlu1 %v1623_v7, %s1559_s5  ;;  %324 = vperm.xlu0 %1395, %v1623_v7  }
 0x103   :  { %901 = vrot.lane.b32.xlu1 %v1696_v32, %s1555_s27  ;;  %899 = vrot.lane.b32.xlu0 %v1694_v31, %s1555_s27 }
 0x107   :  { %877 = vrot.lane.b32.xlu1 %v1696_v32, %s1554_s2  ;;  %875 = vrot.lane.b32.xlu0 %v1694_v31, %s1554_s2 }
 0x10b   :  { %883 = vrot.lane.b32.xlu1 %v1696_v32, %s1556_s28  ;;  %881 = vrot.lane.b32.xlu0 %v1694_v31, %s1556_s28 }
 0x15d   :  { %v232_v34 = vpop.permute.xlu1 %231  ;;  %v262_v35 = vpop.permute.xlu0 %261 }
 0x161   :  { %v241_v37 = vpop.permute.xlu1 %240  ;;  %v234_v38 = vpop.permute.xlu0 %233 }
 0x162   :  { %v238_v41 = vsel %vm237_vm1, %v232_v34, %v234_v38  ;;  %v239_v42 = vsel %vm237_vm1, %v234_v38, %v232_v34 }
 0x163   :  { %v294_v46 = vrot.slane %v238_v41, 4  ;;  %v295_v47 = vrot.slane %v239_v42, 4 }
 0x165   :  { %v248_v39 = vpop.permute.xlu1 %247  ;;  %v243_v40 = vpop.permute.xlu0 %242 }
 0x166   :  { %v245_v43 = vsel %vm244_vm2, %v241_v37, %v243_v40  ;;  %v246_v44 = vsel %vm244_vm2, %v243_v40, %v241_v37  ;;  %v1762_v40 = vld [vmem:[#allocation5] sm:$0xff] }
 0x167   :  { %v270_v48 = vrot.slane %v246_v44, 6  ;;  %v271_v49 = vrot.slane %v245_v43, 6  ;;  %v298_v57 = vrot.slane %v245_v43, 2  ;;  %v299_v58 = vrot.slane %v246_v44, 2 }
 0x169   :  { %v264_v50 = vpop.permute.xlu1 %263  ;;  %v250_v51 = vpop.permute.xlu0 %249  ;;  %v303_v19 = vsel %vm302_vm5, %v239_v42, %v270_v48  ;;  %v304_v20 = vsel %vm302_vm5, %v238_v41, %v271_v49 }
 0x16a   :  { %v266_v53 = vsel %vm265_vm3, %v262_v35, %v264_v50  ;;  %v267_v54 = vsel %vm265_vm3, %v264_v50, %v262_v35  ;;  %v252_v55 = vsel %vm251_vm4, %v248_v39, %v250_v51  ;;  %v253_v56 = vsel %vm251_vm4, %v250_v51, %v248_v39  ;;  %v1760_v39 = vld [vmem:[#allocation5 + $0x8] sm:$0xff] }
 0x16b   :  { %v288_v59 = vrot.slane %v266_v53, 6  ;;  %v289_v60 = vrot.slane %v267_v54, 6  ;;  %v276_v61 = vrot.slane %v253_v56, 4  ;;  %v277_v62 = vrot.slane %v252_v55, 4 }
 0x16c   :  { %v321_v63 = vmul.f32 %v252_v55, %v1725_v45  ;;  %v322_v1 = vmul.f32 %v253_v56, %v1728_v52 }
 0x16d   :  { %v311_v21 = vsel %vm302_vm5, %v1668_v24, %v288_v59  ;;  %v312_v22 = vsel %vm302_vm5, %v1674_v26, %v289_v60  ;;  %v255_v23 = vpop.permute.xlu1 %254  ;;  %v257_v25 = vpop.permute.xlu0 %256  ;;  %v307_v43 = vsel %vm305_vm7, %v304_v20, %v277_v62  ;;  %v306_v44 = vsel %vm305_vm7, %v303_v19, %v276_v61 }
 0x16e   :  { %1343 = vmatprep.subr.msk.mxu1 %vm302_vm5, %v322_v1  ;;  %v259_v29 = vsel %vm258_vm6, %v255_v23, %v257_v25  ;;  %v260_v30 = vsel %vm258_vm6, %v257_v25, %v255_v23  ;;  %v314_v34 = vsel %vm305_vm7, %v312_v22, %v295_v47  ;;  %v313_v24 = vsel %vm305_vm7, %v311_v21, %v294_v46 }
 0x16f   :  { %v282_v35 = vrot.slane %v260_v30, 2  ;;  %v283_v26 = vrot.slane %v259_v29, 2  ;;  %1344 = vmatpush1.msk.msra.mxu1 %vm302_vm5, %v321_v63  ;;  %v316_v37 = vsel %vm308_vm8, %v314_v34, %v299_v58  ;;  %v315_v38 = vsel %vm308_vm8, %v313_v24, %v298_v57 }
 0x170   :  { %v320_v41 = vmul.f32 %v316_v37, %v1746_v27  ;;  %v319_v42 = vmul.f32 %v315_v38, %v1748_v28  ;;  %v68_v59 = vadd.f32 %v1618_v6, %v1626_v8  ;;  %v723_v60 = vadd.f32 %v1657_v17, %v1660_v18 }
 0x171   :  { %v310_v46 = vsel %vm308_vm8, %v307_v43, %v283_v26  ;;  %v309_v47 = vsel %vm308_vm8, %v306_v44, %v282_v35  ;;  %v1772_v50 = vpop.permute.xlu1 %327  ;;  %v71_v61 = vadd.f32 %v1612_v4, %v1615_v5  ;;  %v65_v62 = vadd.f32 %v1630_v9, %v1633_v10  ;;  %v1833_v5 = vld [vmem:[%s2077_s1] sm:$0xff] }
 0x172   :  { %366 = vmatprep.subr.mxu1 %v320_v41  ;;  %v318_v48 = vmul.f32 %v310_v46, %v1760_v39  ;;  %v317_v49 = vmul.f32 %v309_v47, %v1762_v40  ;;  %v74_v63 = vadd.f32 %v1608_v2, %v1610_v3  ;;  %v726_v1 = vadd.f32 %v1650_v15, %v1654_v16 }
 0x173   :  { %367 = vmatpush1.msra.mxu1 %v319_v42  ;;  %v729_v6 = vadd.f32 %v1642_v13, %v1647_v14  ;;  %v732_v4 = vadd.f32 %v1636_v11, %v1639_v12 }
 0x174   :  { %368 = vmatprep.subr.mxu1 %v318_v48 }
 0x175   :  { %369 = vmatpush1.msra.mxu1 %v317_v49  ;;  %v902_v2 = vpop.permute.xlu1 %901 }
 0x176   :  { %1345 = vmatmul.mubr.msk.f32.vlgmr.msra.gmra.mxu1 %vm329_vm9, %v1772_v50 }
 0x177   :  { %571 = vmatprep.mubr.f32.mxu1 %v1551_v0 }
 0x179   :  { %v878_v8 = vpop.permute.xlu1 %877 }
 0x17a   :  { %v1777_v51 = vpop.permute.xlu0 %324 }
 0x17d   :  { %v884_v10 = vpop.permute.xlu1 %883 }
 0x17e   :  { %v900_v3 = vpop.permute.xlu0 %899 }
 0x17f   :  { %v903_v25 = vsel %vm265_vm3, %v900_v3, %v902_v2  ;;  %v904_v37 = vsel %vm265_vm3, %v902_v2, %v900_v3 }
 0x180   :  { %v925_v42 = vrot.slane %v903_v25, 6 }
 0x182   :  { %v876_v9 = vpop.permute.xlu0 %875 }
 0x183   :  { %v1854_v43 = vsel %vm237_vm1, %v876_v9, %v878_v8  ;;  %v880_v47 = vsel %vm237_vm1, %v878_v8, %v876_v9 }
 0x184   :  { %v931_v3 = vrot.slane %v1854_v43, 4  ;;  %v932_v8 = vrot.slane %v880_v47, 4 }
 0x186   :  { %v882_v15 = vpop.permute.xlu0 %881 }
 0x187   :  { %v886_v48 = vsel %vm244_vm2, %v884_v10, %v882_v15  ;;  %v885_v9 = vsel %vm244_vm2, %v882_v15, %v884_v10 }
 0x236   :  { %v404_v53 = vpop.f32.mrf.mxu1 }
 0x237   :  { %v405_v54 = vadd.f32 %v404_v53, %v1777_v51 }
 0x238   :  { %v406_v55 = vpop.f32.mrf.mxu1 }
 0x239   :  { %v1780_v56 = vmax.f32 %v405_v54, 0.0  ;;  %v407_v57 = vadd.f32 %v406_v55, %v1777_v51 }
 0x23b   :  { %411 = vrot.lane.b32.xlu0 %v1780_v56, %s1554_s2  ;;  %435 = vrot.lane.b32.xlu1 %v1780_v56, %s1555_s27  ;;  %v1787_v58 = vmax.f32 %v407_v57, 0.0 }
 0x23f   :  { %417 = vrot.lane.b32.xlu0 %v1780_v56, %s1556_s28  ;;  %437 = vrot.lane.b32.xlu1 %v1787_v58, %s1555_s27 }
 0x243   :  { %423 = vrot.lane.b32.xlu0 %v1780_v56, %s1557_s29  ;;  %413 = vrot.lane.b32.xlu1 %v1787_v58, %s1554_s2 }
 0x247   :  { %429 = vrot.lane.b32.xlu0 %v1780_v56, %s1558_s30  ;;  %419 = vrot.lane.b32.xlu1 %v1787_v58, %s1556_s28 }
 0x24b   :  { %887 = vrot.lane.b32.xlu0 %v1694_v31, %s1557_s29  ;;  %425 = vrot.lane.b32.xlu1 %v1787_v58, %s1557_s29 }
 0x24f   :  { %893 = vrot.lane.b32.xlu0 %v1694_v31, %s1558_s30  ;;  %431 = vrot.lane.b32.xlu1 %v1787_v58, %s1558_s30 }
 0x253   :  { %889 = vrot.lane.b32.xlu1 %v1696_v32, %s1557_s29  ;;  %497 = vrot.lane.b32.xlu0 %v1623_v7, %s1560_s6 }
 0x257   :  { %895 = vrot.lane.b32.xlu1 %v1696_v32, %s1558_s30 }
 0x272   :  { %69 = vadd.xlane.f32.xlu0 %v68_v59 }
 0x276   :  { %724 = vadd.xlane.f32.xlu0 %v723_v60 }
 0x27a   :  { %72 = vadd.xlane.f32.xlu0 %v71_v61 }
 0x27b   :  { %66 = vadd.xlane.f32.xlu1 %v65_v62 }
 0x27e   :  { %75 = vadd.xlane.f32.xlu0 %v74_v63 }
 0x27f   :  { %727 = vadd.xlane.f32.xlu1 %v726_v1  ;;  %v926_v1 = vrot.slane %v904_v37, 6 }
 0x283   :  { %730 = vadd.xlane.f32.xlu1 %v729_v6  ;;  %v945_v6 = vsel %vm302_vm5, %v1694_v31, %v925_v42 }
 0x287   :  { %733 = vadd.xlane.f32.xlu1 %v732_v4 }
 0x294   :  { %101 = vrot.lane.b32.xlu0 %v1833_v5, %s1561_s9 }
 0x2ad   :  { %v436_v13 = vpop.permute.xlu1 %435  ;;  %v412_v14 = vpop.permute.xlu0 %411 }
 0x2b1   :  { %v438_v16 = vpop.permute.xlu1 %437  ;;  %v418_v17 = vpop.permute.xlu0 %417 }
 0x2b2   :  { %v439_v11 = vsel %vm265_vm3, %v436_v13, %v438_v16  ;;  %v440_v12 = vsel %vm265_vm3, %v438_v16, %v436_v13  ;;  %v936_v16 = vrot.slane %v886_v48, 2 }
 0x2b3   :  { %v461_v22 = vrot.slane %v439_v11, 6  ;;  %v462_v23 = vrot.slane %v440_v12, 6 }
 0x2b5   :  { %v414_v18 = vpop.permute.xlu1 %413  ;;  %v424_v19 = vpop.permute.xlu0 %423  ;;  %v481_v44 = vsel %vm302_vm5, %v1780_v56, %v461_v22  ;;  %v482_v46 = vsel %vm302_vm5, %v1787_v58, %v462_v23  ;;  %v946_v22 = vsel %vm302_vm5, %v1696_v32, %v926_v1  ;;  %v935_v23 = vrot.slane %v885_v9, 2 }
 0x2b6   :  { %v415_v20 = vsel %vm237_vm1, %v412_v14, %v414_v18  ;;  %v416_v21 = vsel %vm237_vm1, %v414_v18, %v412_v14 }
 0x2b7   :  { %v467_v29 = vrot.slane %v415_v20, 4  ;;  %v468_v30 = vrot.slane %v416_v21, 4 }
 0x2b9   :  { %v420_v34 = vpop.permute.xlu1 %419  ;;  %v430_v24 = vpop.permute.xlu0 %429  ;;  %v483_v49 = vsel %vm305_vm7, %v481_v44, %v467_v29  ;;  %v484_v55 = vsel %vm305_vm7, %v482_v46, %v468_v30  ;;  %v907_v30 = vrot.slane %v886_v48, 6 }
 0x2ba   :  { %v421_v35 = vsel %vm244_vm2, %v418_v17, %v420_v34  ;;  %v422_v26 = vsel %vm244_vm2, %v420_v34, %v418_v17 }
 0x2bb   :  { %v471_v38 = vrot.slane %v421_v35, 2  ;;  %v472_v41 = vrot.slane %v422_v26, 2  ;;  %v443_v57 = vrot.slane %v422_v26, 6  ;;  %v444_v60 = vrot.slane %v421_v35, 6 }
 0x2bd   :  { %v426_v53 = vpop.permute.xlu1 %425  ;;  %v888_v54 = vpop.permute.xlu0 %887  ;;  %v486_v58 = vsel %vm308_vm8, %v484_v55, %v472_v41  ;;  %v485_v61 = vsel %vm308_vm8, %v483_v49, %v471_v38  ;;  %v475_v12 = vsel %vm302_vm5, %v416_v21, %v443_v57  ;;  %v476_v10 = vsel %vm302_vm5, %v415_v20, %v444_v60 }
 0x2be   :  { %v427_v59 = vsel %vm251_vm4, %v424_v19, %v426_v53  ;;  %v428_v56 = vsel %vm251_vm4, %v426_v53, %v424_v19  ;;  %v490_v14 = vmul.f32 %v486_v58, %v1746_v27  ;;  %v489_v11 = vmul.f32 %v485_v61, %v1748_v28 }
 0x2bf   :  { %v491_v62 = vmul.f32 %v427_v59, %v1725_v45  ;;  %v492_v63 = vmul.f32 %v428_v56, %v1728_v52  ;;  %v449_v4 = vrot.slane %v428_v56, 4  ;;  %v450_v2 = vrot.slane %v427_v59, 4 }
 0x2c0   :  { %v948_v20 = vsel %vm305_vm7, %v946_v22, %v932_v8  ;;  %v947_v38 = vsel %vm305_vm7, %v945_v6, %v931_v3  ;;  %v908_v41 = vrot.slane %v885_v9, 6 }
 0x2c1   :  { %v432_v13 = vpop.permute.xlu1 %431  ;;  %1346 = vmatprep.subr.msk.mxu1 %vm302_vm5, %v492_v63  ;;  %v894_v19 = vpop.permute.xlu0 %893  ;;  %v477_v25 = vsel %vm305_vm7, %v475_v12, %v449_v4  ;;  %v478_v29 = vsel %vm305_vm7, %v476_v10, %v450_v2  ;;  %v950_v46 = vsel %vm308_vm8, %v948_v20, %v936_v16  ;;  %v949_v48 = vsel %vm308_vm8, %v947_v38, %v935_v23 }
 0x2c2   :  { %v433_v17 = vsel %vm258_vm6, %v430_v24, %v432_v13  ;;  %v434_v31 = vsel %vm258_vm6, %v432_v13, %v430_v24  ;;  %1347 = vmatpush1.msk.msra.mxu1 %vm302_vm5, %v491_v62  ;;  %v954_v58 = vmul.f32 %v950_v46, %v1746_v27  ;;  %v953_v62 = vmul.f32 %v949_v48, %v1748_v28 }
 0x2c3   :  { %v455_v15 = vrot.slane %v434_v31, 2  ;;  %v456_v18 = vrot.slane %v433_v17, 2  ;;  %535 = vmatprep.subr.mxu1 %v490_v14  ;;  %v1934_v14 = vld [vmem:[%s2077_s1 + $0x8] sm:$0xff] }
 0x2c4   :  { %536 = vmatpush1.msra.mxu1 %v489_v11 }
 0x2c5   :  { %v479_v34 = vsel %vm308_vm8, %v477_v25, %v455_v15  ;;  %v890_v24 = vpop.permute.xlu1 %889  ;;  %v480_v21 = vsel %vm308_vm8, %v478_v29, %v456_v18  ;;  %v1904_v44 = vpop.permute.xlu0 %497 }
 0x2c6   :  { %v891_v35 = vsel %vm251_vm4, %v888_v54, %v890_v24  ;;  %v892_v32 = vsel %vm251_vm4, %v890_v24, %v888_v54  ;;  %v488_v26 = vmul.f32 %v480_v21, %v1760_v39  ;;  %v487_v37 = vmul.f32 %v479_v34, %v1762_v40 }
 0x2c7   :  { %v956_v42 = vmul.f32 %v892_v32, %v1728_v52  ;;  %v913_v49 = vrot.slane %v892_v32, 4  ;;  %v914_v53 = vrot.slane %v891_v35, 4  ;;  %v939_v54 = vsel %vm302_vm5, %v880_v47, %v907_v30  ;;  %v1949_v30 = vld [vmem:[%s2077_s1 + $0x18] sm:$0xff] }
 0x2c8   :  { %537 = vmatprep.subr.mxu1 %v488_v26  ;;  %v955_v55 = vmul.f32 %v891_v35, %v1725_v45  ;;  %v940_v47 = vsel %vm302_vm5, %v1854_v43, %v908_v41 }
 0x2c9   :  { %v896_v57 = vpop.permute.xlu1 %895  ;;  %538 = vmatpush1.msra.mxu1 %v487_v37  ;;  %v941_v63 = vsel %vm305_vm7, %v939_v54, %v913_v49  ;;  %v942_v1 = vsel %vm305_vm7, %v940_v47, %v914_v53 }
 0x2ca   :  { %v897_v59 = vsel %vm258_vm6, %v894_v19, %v896_v57  ;;  %v898_v56 = vsel %vm258_vm6, %v896_v57, %v894_v19  ;;  %1358 = vmatprep.subr.msk.mxu1 %vm302_vm5, %v956_v42  ;;  %1348 = vmatmul.mubr.msk.f32.vlgmr.msra.gmra.mxu1 %vm329_vm9, %v1904_v44 }
 0x2cb   :  { %v919_v60 = vrot.slane %v898_v56, 2  ;;  %v920_v61 = vrot.slane %v897_v59, 2  ;;  %1359 = vmatpush1.msk.msra.mxu1 %vm302_vm5, %v955_v55  ;;  %1027 = vmatprep.mubr.f32.mxu1 %v1551_v0 }
 0x2cc   :  { %991 = vmatprep.subr.mxu1 %v954_v58 }
 0x2cd   :  { %v943_v6 = vsel %vm308_vm8, %v941_v63, %v919_v60  ;;  %992 = vmatpush1.msra.mxu1 %v953_v62  ;;  %v944_v4 = vsel %vm308_vm8, %v942_v1, %v920_v61 }
 0x2ce   :  { %v952_v43 = vmul.f32 %v944_v4, %v1760_v39  ;;  %v951_v2 = vmul.f32 %v943_v6, %v1762_v40 }
 0x2d0   :  { %993 = vmatprep.subr.mxu1 %v952_v43 }
 0x2d1   :  { %994 = vmatpush1.msra.mxu1 %v951_v2 }
 0x2d2   :  { %1360 = vmatmul.mubr.msk.f32.vlgmr.msra.gmra.mxu1 %vm329_vm9, %v1772_v50  ;;  %v1941_v50 = vld [vmem:[%s2077_s1 + $0x10] sm:$0xff]  ;;  %s1562_s1 = smov 2  }
 0x2fb   :  { %v70_v0 = vpop.xlane.xlu0 %69 }
 0x2fc   :  { %v79_v9 = vmul.f32 0.00390625, %v70_v0 }
 0x2fe   :  { %v83_v31 = vmul.f32 %v79_v9, %v1934_v14 }
 0x2ff   :  { %v725_v3 = vpop.xlane.xlu0 %724 }
 0x300   :  { %v88_v15 = vsel %vm86_vm10, %v83_v31, 0.0  ;;  %v735_v18 = vmul.f32 0.00390625, %v725_v3 }
 0x302   :  { %v739_v24 = vmul.f32 %v735_v18, %v1833_v5 }
 0x303   :  { %v73_v13 = vpop.xlane.xlu0 %72 }
 0x304   :  { %v67_v8 = vpop.xlane.xlu1 %66  ;;  %v80_v12 = vmul.f32 0.00390625, %v73_v13  ;;  %v743_v37 = vsel %vm86_vm10, %v739_v24, 0.0 }
 0x305   :  { %v78_v16 = vmul.f32 0.00390625, %v67_v8 }
 0x306   :  { %v84_v25 = vmul.f32 %v80_v12, %v1941_v50 }
 0x307   :  { %v82_v11 = vmul.f32 %v78_v16, %v1833_v5  ;;  %v76_v10 = vpop.xlane.xlu0 %75 }
 0x308   :  { %v728_v17 = vpop.xlane.xlu1 %727  ;;  %v81_v29 = vmul.f32 0.00390625, %v76_v10  ;;  %v90_v20 = vsel %vm86_vm10, %v84_v25, 0.0  ;;  %v107_v10 = vshrl.u32 %v106_v33, 7 }
 0x309   :  { %v87_v22 = vsel %vm86_vm10, %v82_v11, 0.0  ;;  %v736_v23 = vmul.f32 0.00390625, %v728_v17 }
 0x30a   :  { %v89_v34 = vadd.f32 %v88_v15, %v87_v22  ;;  %v85_v32 = vmul.f32 %v81_v29, %v1949_v30  ;;  %v1975_v18 = vsub.s32 0, %v107_v10 }
 0x30b   :  { %v740_v21 = vmul.f32 %v736_v23, %v1934_v14  ;;  %v102_v31 = vpop.permute.xlu0 %101 }
 0x30c   :  { %v731_v19 = vpop.xlane.xlu1 %730  ;;  %v91_v38 = vadd.f32 %v90_v20, %v89_v34  ;;  %v92_v46 = vsel %vm86_vm10, %v85_v32, 0.0 }
 0x30d   :  { %v737_v35 = vmul.f32 0.00390625, %v731_v19  ;;  %v744_v41 = vsel %vm86_vm10, %v740_v21, 0.0 }
 0x30e   :  { %v745_v49 = vadd.f32 %v744_v41, %v743_v37  ;;  %v93_v53 = vadd.f32 %v92_v46, %v91_v38 }
 0x30f   :  { %v741_v42 = vmul.f32 %v737_v35, %v1941_v50 }
 0x310   :  { %v734_v26 = vpop.xlane.xlu1 %733  ;;  %v94_v59 = vrot.slane %v93_v53, 4 }
 0x311   :  { %v738_v48 = vmul.f32 0.00390625, %v734_v26  ;;  %v746_v54 = vsel %vm86_vm10, %v741_v42, 0.0 }
 0x312   :  { %v747_v57 = vadd.f32 %v746_v54, %v745_v49  ;;  %v95_v58 = vadd.f32 %v94_v59, %v93_v53 }
 0x313   :  { %v742_v55 = vmul.f32 %v738_v48, %v1949_v30 }
 0x314   :  { %v96_v62 = vrot.slane %v95_v58, 2 }
 0x315   :  { %v748_v56 = vsel %vm86_vm10, %v742_v55, 0.0 }
 0x316   :  { %v749_v47 = vadd.f32 %v748_v56, %v747_v57  ;;  %v97_v6 = vadd.f32 %v96_v62, %v95_v58 }
 0x318   :  { %v750_v61 = vrot.slane %v749_v47, 4  ;;  %v98_v3 = vrot.slane %v97_v6, 1 }
 0x31a   :  { %v751_v1 = vadd.f32 %v750_v61, %v749_v47  ;;  %v99_v13 = vadd.f32 %v98_v3, %v97_v6 }
 0x31c   :  { %v752_v8 = vrot.slane %v751_v1, 2  ;;  %v104_v11 = vadd.f32 %v102_v31, %v99_v13 }
 0x31e   :  { %v753_v16 = vadd.f32 %v752_v8, %v751_v1 }
 0x320   :  { %v754_v12 = vrot.slane %v753_v16, 1 }
 0x322   :  { %v755_v15 = vadd.f32 %v754_v12, %v753_v16 }
 0x324   :  { %v756_v19 = vadd.f32 %v755_v15, %v102_v31 }
 0x326   :  { %v757_v33 = vmax.f32 %v756_v19, 0.0 }
 0x328   :  { %v761_v23 = vrot.slane %v757_v33, %v1975_v18 }
 0x38a   :  { %v1962_v60 = vpop.f32.mrf.mxu1 }
 0x38c   :  { %v1964_v63 = vpop.f32.mrf.mxu1 }
 0x392   :  { %v1029_v4 = vpop.f32.mrf.mxu1 }
 0x393   :  { %v1030_v43 = vadd.f32 %v1029_v4, %v1777_v51 }
 0x394   :  { %v1031_v2 = vpop.f32.mrf.mxu1 }
 0x395   :  { %v1034_v0 = vmax.f32 %v1030_v43, 0.0  ;;  %v1032_v9 = vadd.f32 %v1031_v2, %v1777_v51  ;;  %v105_v51 = vmax.f32 %v104_v11, 0.0 }
 0x397   :  { %1060 = vrot.lane.b32.xlu1 %v1034_v0, %s1555_s27  ;;  %1036 = vrot.lane.b32.xlu0 %v1034_v0, %s1554_s2  ;;  %v1035_v17 = vmax.f32 %v1032_v9, 0.0  ;;  %v109_v22 = vrot.slane %v105_v51, %v1975_v18 }
 0x39b   :  { %1062 = vrot.lane.b32.xlu1 %v1035_v17, %s1555_s27  ;;  %1042 = vrot.lane.b32.xlu0 %v1034_v0, %s1556_s28 }
 0x39f   :  { %1038 = vrot.lane.b32.xlu1 %v1035_v17, %s1554_s2  ;;  %1048 = vrot.lane.b32.xlu0 %v1034_v0, %s1557_s29 }
 0x3a3   :  { %1044 = vrot.lane.b32.xlu1 %v1035_v17, %s1556_s28  ;;  %1054 = vrot.lane.b32.xlu0 %v1034_v0, %s1558_s30 }
 0x3a7   :  { %1050 = vrot.lane.b32.xlu1 %v1035_v17, %s1557_s29  ;;  %111 = vrot.lane.b32.xlu0 %v109_v22, %s1562_s1 }
 0x3ab   :  { %1056 = vrot.lane.b32.xlu1 %v1035_v17, %s1558_s30 }
 0x3af   :  { %763 = vrot.lane.b32.xlu1 %v761_v23, %s1562_s1 }
 0x409   :  { %v1061_v25 = vpop.permute.xlu1 %1060  ;;  %v1037_v29 = vpop.permute.xlu0 %1036 }
 0x40d   :  { %v1063_v34 = vpop.permute.xlu1 %1062  ;;  %v1043_v24 = vpop.permute.xlu0 %1042 }
 0x40e   :  { %v1065_v21 = vsel %vm265_vm3, %v1063_v34, %v1061_v25  ;;  %v1064_v20 = vsel %vm265_vm3, %v1061_v25, %v1063_v34 }
 0x40f   :  { %v1087_v38 = vrot.slane %v1065_v21, 6  ;;  %v1086_v41 = vrot.slane %v1064_v20, 6  ;;  %v1564_v20 = vmov 71  }
 0x410   :  { %1396 = vset.pattern.permute.xlu1 %v1564_v20 }
 0x411   :  { %v1039_v35 = vpop.permute.xlu1 %1038  ;;  %v1049_v32 = vpop.permute.xlu0 %1048  ;;  %v1107_v55 = vsel %vm302_vm5, %v1035_v17, %v1087_v38  ;;  %v1106_v56 = vsel %vm302_vm5, %v1034_v0, %v1086_v41 }
 0x412   :  { %v1040_v26 = vsel %vm237_vm1, %v1037_v29, %v1039_v35  ;;  %v1041_v37 = vsel %vm237_vm1, %v1039_v35, %v1037_v29 }
 0x413   :  { %v1093_v42 = vrot.slane %v1041_v37, 4  ;;  %v1092_v46 = vrot.slane %v1040_v26, 4 }
 0x415   :  { %v1045_v48 = vpop.permute.xlu1 %1044  ;;  %v1055_v49 = vpop.permute.xlu0 %1054  ;;  %v1109_v58 = vsel %vm305_vm7, %v1107_v55, %v1093_v42  ;;  %v1108_v47 = vsel %vm305_vm7, %v1106_v56, %v1092_v46 }
 0x416   :  { %v1046_v53 = vsel %vm244_vm2, %v1043_v24, %v1045_v48  ;;  %v1047_v54 = vsel %vm244_vm2, %v1045_v48, %v1043_v24 }
 0x417   :  { %v1096_v57 = vrot.slane %v1046_v53, 2  ;;  %v1097_v59 = vrot.slane %v1047_v54, 2  ;;  %v1068_v61 = vrot.slane %v1047_v54, 6  ;;  %v1069_v0 = vrot.slane %v1046_v53, 6 }
 0x419   :  { %v1051_v62 = vpop.permute.xlu1 %1050  ;;  %v112_v1 = vpop.permute.xlu0 %111  ;;  %v1111_v6 = vsel %vm308_vm8, %v1109_v58, %v1097_v59  ;;  %v1110_v8 = vsel %vm308_vm8, %v1108_v47, %v1096_v57  ;;  %v1100_v31 = vsel %vm302_vm5, %v1041_v37, %v1068_v61  ;;  %v1101_v15 = vsel %vm302_vm5, %v1040_v26, %v1069_v0 }
 0x41a   :  { %v1052_v4 = vsel %vm251_vm4, %v1049_v32, %v1051_v62  ;;  %v1053_v43 = vsel %vm251_vm4, %v1051_v62, %v1049_v32  ;;  %v115_v2 = vmul.f32 %v112_v1, %v1934_v14  ;;  %v114_v3 = vmul.f32 %v112_v1, %v1833_v5 }
 0x41b   :  { %v1116_v9 = vmul.f32 %v1052_v4, %v1725_v45  ;;  %v1117_v13 = vmul.f32 %v1053_v43, %v1728_v52  ;;  %v1074_v16 = vrot.slane %v1053_v43, 4  ;;  %v1075_v17 = vrot.slane %v1052_v4, 4 }
 0x41c   :  { %124 = vrot.lane.b32.xlu1 %v115_v2, %s1563_s16  ;;  %122 = vrot.lane.b32.xlu0 %v114_v3, %s1563_s16  ;;  %v1115_v12 = vmul.f32 %v1111_v6, %v1746_v27  ;;  %v1114_v52 = vmul.f32 %v1110_v8, %v1748_v28  ;;  %v117_v51 = vmul.f32 %v112_v1, %v1949_v30  ;;  %v1566_v58 = vmov 7  }
 0x41d   :  { %v1057_v11 = vpop.permute.xlu1 %1056  ;;  %1361 = vmatprep.subr.msk.mxu0 %vm302_vm5, %v1117_v13  ;;  %v116_v33 = vmul.f32 %v112_v1, %v1941_v50  ;;  %v1102_v27 = vsel %vm305_vm7, %v1100_v31, %v1074_v16  ;;  %v1103_v36 = vsel %vm305_vm7, %v1101_v15, %v1075_v17  ;;  %v1567_v47 = vmov 4  }
 0x41e   :  { %v1058_v10 = vsel %vm258_vm6, %v1055_v49, %v1057_v11  ;;  %v1059_v45 = vsel %vm258_vm6, %v1057_v11, %v1055_v49  ;;  %1362 = vmatpush1.msk.msra.mxu0 %vm302_vm5, %v1116_v9 }
 0x41f   :  { %v1080_v19 = vrot.slane %v1059_v45, 2  ;;  %v1081_v22 = vrot.slane %v1058_v10, 2  ;;  %1152 = vmatprep.subr.mxu0 %v1115_v12 }
 0x420   :  { %1153 = vmatpush1.msra.mxu0 %v1114_v52  ;;  %128 = vrot.lane.b32.xlu1 %v117_v51, %s1563_s16 }
 0x421   :  { %v1104_v23 = vsel %vm308_vm8, %v1102_v27, %v1080_v19  ;;  %126 = vrot.lane.b32.xlu0 %v116_v33, %s1563_s16  ;;  %v764_v28 = vpop.permute.xlu1 %763  ;;  %v1105_v25 = vsel %vm308_vm8, %v1103_v36, %v1081_v22 }
 0x422   :  { %v1113_v29 = vmul.f32 %v1105_v25, %v1760_v39  ;;  %v767_v34 = vmul.f32 %v764_v28, %v1934_v14  ;;  %v766_v24 = vmul.f32 %v764_v28, %v1833_v5  ;;  %v1112_v21 = vmul.f32 %v1104_v23, %v1762_v40 }
 0x423   :  { %v769_v35 = vmul.f32 %v764_v28, %v1949_v30  ;;  %v768_v39 = vmul.f32 %v764_v28, %v1941_v50  ;;  %v1565_v40 = vmov 68  }
 0x424   :  { %1154 = vmatprep.subr.mxu0 %v1113_v29  ;;  %776 = vrot.lane.b32.xlu1 %v767_v34, %s1563_s16 }
 0x425   :  { %774 = vrot.lane.b32.xlu0 %v766_v24, %s1563_s16  ;;  %1155 = vmatpush1.msra.mxu0 %v1112_v21 }
 0x426   :  { %1363 = vmatmul.mubr.msk.f32.vlgmr.msra.gmra.mxu0 %vm329_vm9, %v1904_v44  ;;  %1397 = vset.pattern.permute.xlu0 %v1565_v40 }
 0x428   :  { %780 = vrot.lane.b32.xlu1 %v769_v35, %s1563_s16 }
 0x429   :  { %778 = vrot.lane.b32.xlu0 %v768_v39, %s1563_s16 }
 0x48e   :  { %v125_v32 = vpop.permute.xlu1 %124  ;;  %v123_v26 = vpop.permute.xlu0 %122 }
 0x48f   :  { %v137_v37 = vsel %vm86_vm10, %v125_v32, 0.0  ;;  %v134_v38 = vsel %vm86_vm10, %v123_v26, 0.0 }
 0x490   :  { %138 = vadd.xlane.f32.xlu1 %v137_v37  ;;  %135 = vadd.xlane.f32.xlu0 %v134_v38 }
 0x492   :  { %v129_v41 = vpop.permute.xlu1 %128 }
 0x493   :  { %v127_v44 = vpop.permute.xlu0 %126  ;;  %v143_v49 = vsel %vm86_vm10, %v129_v41, 0.0 }
 0x494   :  { %v140_v42 = vsel %vm86_vm10, %v127_v44, 0.0 }
 0x495   :  { %141 = vadd.xlane.f32.xlu0 %v140_v42 }
 0x496   :  { %v777_v46 = vpop.permute.xlu1 %776 }
 0x497   :  { %v775_v48 = vpop.permute.xlu0 %774  ;;  %v789_v55 = vsel %vm86_vm10, %v777_v46, 0.0 }
 0x498   :  { %v786_v53 = vsel %vm86_vm10, %v775_v48, 0.0 }
 0x499   :  { %144 = vadd.xlane.f32.xlu0 %v143_v49  ;;  %787 = vadd.xlane.f32.xlu1 %v786_v53 }
 0x49a   :  { %v781_v59 = vpop.permute.xlu1 %780 }
 0x49b   :  { %v779_v54 = vpop.permute.xlu0 %778  ;;  %v795_v56 = vsel %vm86_vm10, %v781_v59, 0.0 }
 0x49c   :  { %v792_v57 = vsel %vm86_vm10, %v779_v54, 0.0 }
 0x49d   :  { %790 = vadd.xlane.f32.xlu0 %v789_v55  ;;  %793 = vadd.xlane.f32.xlu1 %v792_v57 }
 0x4a1   :  { %796 = vadd.xlane.f32.xlu0 %v795_v56 }
 0x4ae   :  { %494 = vperm.xlu1 %1396, %v1623_v7  }
 0x4b2   :  { %1398 = vset.pattern.permute.xlu1 %v1566_v58 }
 0x4b3   :  { %601 = vperm.xlu1 %1398, %v1833_v5  }
 0x4b7   :  { %581 = vperm.xlu0 %1397, %v1623_v7   ;;  %1399 = vset.pattern.permute.xlu1 %v1567_v47 }
 0x4bb   :  { %1400 = vset.pattern.permute.xlu0 %v1567_v47 }
 0x4e6   :  { %v1190_v19 = vpop.f32.mrf.mxu0 }
 0x4e8   :  { %v1192_v27 = vpop.f32.mrf.mxu0 }
 0x519   :  { %v136_v61 = vpop.xlane.xlu0 %135  ;;  %v139_v1 = vpop.xlane.xlu1 %138 }
 0x51a   :  { %v146_v62 = vadd.f32 %v136_v61, %v1833_v5  ;;  %v147_v6 = vadd.f32 %v139_v1, %v1934_v14 }
 0x51c   :  { %608 = vperm.xlu1 %1399, %v146_v62  }
 0x51e   :  { %v142_v4 = vpop.xlane.xlu0 %141 }
 0x51f   :  { %v148_v43 = vadd.f32 %v142_v4, %v1941_v50 }
 0x520   :  { %613 = vperm.xlu1 %1399, %v147_v6  }
 0x522   :  { %v145_v2 = vpop.xlane.xlu0 %144  ;;  %v788_v7 = vpop.xlane.xlu1 %787 }
 0x523   :  { %v149_v3 = vadd.f32 %v145_v2, %v1949_v30  ;;  %v798_v8 = vadd.f32 %v788_v7, %v1833_v5 }
 0x524   :  { %618 = vperm.xlu1 %1399, %v148_v43  }
 0x526   :  { %v791_v0 = vpop.xlane.xlu0 %790  ;;  %v794_v17 = vpop.xlane.xlu1 %793 }
 0x527   :  { %v799_v16 = vadd.f32 %v791_v0, %v1934_v14  ;;  %v800_v31 = vadd.f32 %v794_v17, %v1941_v50 }
 0x528   :  { %623 = vperm.xlu1 %1399, %v149_v3  }
 0x52a   :  { %v797_v9 = vpop.xlane.xlu0 %796  ;;  %v495_v11 = vpop.permute.xlu1 %494 }
 0x52b   :  { %v801_v13 = vadd.f32 %v797_v9, %v1949_v30  ;;  %v574_v12 = vadd.f32 %v1962_v60, %v495_v11  ;;  %v576_v10 = vadd.f32 %v1964_v63, %v495_v11  ;;  %v1191_v50 = vadd.f32 %v1190_v19, %v495_v11 }
 0x52c   :  { %1217 = vperm.xlu1 %1399, %v798_v8   ;;  %v1193_v36 = vadd.f32 %v1192_v27, %v495_v11 }
 0x52d   :  { %1232 = vperm.xlu0 %1400, %v801_v13   ;;  %v578_v52 = vmax.f32 %v574_v12, 0.0  ;;  %v579_v5 = vmax.f32 %v576_v10, 0.0  ;;  %v1195_v60 = vmax.f32 %v1191_v50, 0.0 }
 0x52e   :  { %v1196_v25 = vmax.f32 %v1193_v36, 0.0  ;;  %v602_v46 = vpop.permute.xlu1 %601 }
 0x530   :  { %1222 = vperm.xlu1 %1399, %v799_v16  }
 0x532   :  { %v582_v45 = vpop.permute.xlu0 %581 }
 0x533   :  { %v584_v51 = vmul.f32 %v582_v45, %v578_v52  ;;  %v585_v15 = vmul.f32 %v582_v45, %v579_v5  ;;  %v1197_v34 = vmul.f32 %v1195_v60, %v582_v45  ;;  %v1198_v24 = vmul.f32 %v1196_v25, %v582_v45 }
 0x534   :  { %1227 = vperm.xlu1 %1399, %v800_v31  }
 0x535   :  { %v586_v30 = vsel %vm302_vm5, %v584_v51, 0.0  ;;  %v593_v14 = vsel %vm302_vm5, %v585_v15, 0.0  ;;  %v1199_v35 = vsel %vm302_vm5, %v1197_v34, 0.0  ;;  %v1206_v39 = vsel %vm302_vm5, %v1198_v24, 0.0 }
 0x536   :  { %v587_v22 = vrot.slane %v586_v30, 4  ;;  %v594_v33 = vrot.slane %v593_v14, 4  ;;  %v1200_v40 = vrot.slane %v1199_v35, 4  ;;  %v1207_v32 = vrot.slane %v1206_v39, 4 }
 0x538   :  { %v588_v23 = vadd.f32 %v587_v22, %v586_v30  ;;  %v595_v28 = vadd.f32 %v594_v33, %v593_v14  ;;  %v1201_v38 = vadd.f32 %v1200_v40, %v1199_v35  ;;  %v1208_v41 = vadd.f32 %v1207_v32, %v1206_v39 }
 0x53a   :  { %v589_v63 = vrot.slane %v588_v23, 2  ;;  %v596_v29 = vrot.slane %v595_v28, 2  ;;  %v1202_v48 = vrot.slane %v1201_v38, 2  ;;  %v1209_v49 = vrot.slane %v1208_v41, 2 }
 0x53c   :  { %v590_v21 = vadd.f32 %v589_v63, %v588_v23  ;;  %v597_v20 = vadd.f32 %v596_v29, %v595_v28  ;;  %v1203_v59 = vadd.f32 %v1202_v48, %v1201_v38  ;;  %v1210_v56 = vadd.f32 %v1209_v49, %v1208_v41 }
 0x53e   :  { %v591_v26 = vrot.slane %v590_v21, 1  ;;  %v598_v37 = vrot.slane %v597_v20, 1  ;;  %v1204_v62 = vrot.slane %v1203_v59, 1  ;;  %v1211_v1 = vrot.slane %v1210_v56, 1 }
 0x540   :  { %v592_v44 = vadd.f32 %v591_v26, %v590_v21  ;;  %v599_v42 = vadd.f32 %v598_v37, %v597_v20  ;;  %v1205_v0 = vadd.f32 %v1204_v62, %v1203_v59  ;;  %v1212_v7 = vadd.f32 %v1211_v1, %v1210_v56 }
 0x542   :  { %v604_v53 = vadd.f32 %v602_v46, %v592_v44  ;;  %v605_v54 = vadd.f32 %v602_v46, %v599_v42  ;;  %v1213_v31 = vadd.f32 %v1205_v0, %v602_v46  ;;  %v1214_v11 = vadd.f32 %v1212_v7, %v602_v46  ;;  %v1466_v0 = vld [vmem:[#allocation2 + $0x8] sm:$0xff] }
 0x544   :  { %v629_v55 = vrot.slane %v604_v53, %v1975_v18  ;;  %v633_v57 = vrot.slane %v605_v54, %v1975_v18  ;;  %v1238_v51 = vrot.slane %v1213_v31, %v1975_v18  ;;  %v1242_v15 = vrot.slane %v1214_v11, %v1975_v18  ;;  %v1467_v11 = vld [vmem:[#allocation2 + $0x10] sm:$0xff] }
 0x597   :  { %v609_v58 = vpop.permute.xlu1 %608 }
 0x598   :  { %v634_v47 = vmul.f32 %v629_v55, %v609_v58  ;;  %v635_v61 = vmul.f32 %v633_v57, %v609_v58 }
 0x59a   :  { %v1349_v6 = vmul.f32 -1.442695, %v634_v47  ;;  %v1350_v4 = vmul.f32 -1.442695, %v635_v61 }
 0x59b   :  { %v614_v43 = vpop.permute.xlu1 %613 }
 0x59c   :  { %1401 = vpow2.f32 %v1349_v6  ;;  %v636_v2 = vmul.f32 %v629_v55, %v614_v43  ;;  %v637_v3 = vmul.f32 %v633_v57, %v614_v43 }
 0x59d   :  { %1403 = vpow2.f32 %v1350_v4  ;;  %v1465_v4 = vld [vmem:[#allocation2] sm:$0xff] }
 0x59e   :  { %v1351_v8 = vmul.f32 -1.442695, %v636_v2  ;;  %v1352_v9 = vmul.f32 -1.442695, %v637_v3 }
 0x59f   :  { %v619_v13 = vpop.permute.xlu1 %618 }
 0x5a0   :  { %1405 = vpow2.f32 %v1351_v8  ;;  %v638_v16 = vmul.f32 %v629_v55, %v619_v13  ;;  %v639_v17 = vmul.f32 %v633_v57, %v619_v13 }
 0x5a1   :  { %1407 = vpow2.f32 %v1352_v9 }
 0x5a2   :  { %v1353_v12 = vmul.f32 -1.442695, %v638_v16  ;;  %v1354_v10 = vmul.f32 -1.442695, %v639_v17 }
 0x5a3   :  { %v624_v45 = vpop.permute.xlu1 %623 }
 0x5a4   :  { %1409 = vpow2.f32 %v1353_v12  ;;  %v640_v52 = vmul.f32 %v629_v55, %v624_v45  ;;  %v641_v5 = vmul.f32 %v633_v57, %v624_v45 }
 0x5a5   :  { %1411 = vpow2.f32 %v1354_v10 }
 0x5a6   :  { %v1355_v30 = vmul.f32 -1.442695, %v640_v52  ;;  %v1356_v14 = vmul.f32 -1.442695, %v641_v5  ;;  %v1468_v52 = vld [vmem:[#allocation2 + $0x18] sm:$0xff] }
 0x5a7   :  { %v1218_v19 = vpop.permute.xlu1 %1217 }
 0x5a8   :  { %1413 = vpow2.f32 %v1355_v30  ;;  %v1243_v22 = vmul.f32 %v1238_v51, %v1218_v19  ;;  %v1244_v33 = vmul.f32 %v1242_v15, %v1218_v19  ;;  %v1233_v50 = vpop.permute.xlu0 %1232 }
 0x5a9   :  { %v1402_v27 = vpop.eup %1401  ;;  %1415 = vpow2.f32 %v1356_v14  ;;  %v1249_v60 = vmul.f32 %v1238_v51, %v1233_v50  ;;  %v1250_v29 = vmul.f32 %v1242_v15, %v1233_v50 }
 0x5aa   :  { %v1404_v36 = vpop.eup %1403  ;;  %v666_v23 = vadd.f32 1.0, %v1402_v27  ;;  %v1364_v28 = vmul.f32 -1.442695, %v1243_v22  ;;  %v1365_v63 = vmul.f32 -1.442695, %v1244_v33  ;;  %v1469_v33 = vld [vmem:[#allocation2 + $0x20] sm:$0xff] }
 0x5ab   :  { %v667_v25 = vadd.f32 1.0, %v1404_v36  ;;  %v1223_v34 = vpop.permute.xlu1 %1222  ;;  %v1370_v20 = vmul.f32 -1.442695, %v1249_v60  ;;  %v1371_v40 = vmul.f32 -1.442695, %v1250_v29 }
 0x5ac   :  { %1417 = vrcp.f32 %v666_v23  ;;  %v1245_v35 = vmul.f32 %v1238_v51, %v1223_v34  ;;  %v1246_v32 = vmul.f32 %v1242_v15, %v1223_v34  ;;  %v1470_v23 = vld [vmem:[#allocation2 + $0x28] sm:$0xff] }
 0x5ad   :  { %v1406_v24 = vpop.eup %1405  ;;  %1419 = vrcp.f32 %v667_v25 }
 0x5ae   :  { %v1408_v18 = vpop.eup %1407  ;;  %v668_v21 = vadd.f32 1.0, %v1406_v24  ;;  %1421 = vpow2.f32 %v1364_v28  ;;  %v1366_v44 = vmul.f32 -1.442695, %v1245_v35  ;;  %v1367_v48 = vmul.f32 -1.442695, %v1246_v32  ;;  %v1472_v35 = vld [vmem:[#allocation2 + $0x38] sm:$0xff] }
 0x5af   :  { %v669_v39 = vadd.f32 1.0, %v1408_v18  ;;  %1423 = vpow2.f32 %v1365_v63  ;;  %v1228_v26 = vpop.permute.xlu1 %1227  ;;  %v1471_v18 = vld [vmem:[#allocation2 + $0x30] sm:$0xff] }
 0x5b0   :  { %1425 = vrcp.f32 %v668_v21  ;;  %v1247_v42 = vmul.f32 %v1238_v51, %v1228_v26  ;;  %v1248_v49 = vmul.f32 %v1242_v15, %v1228_v26 }
 0x5b1   :  { %v1410_v37 = vpop.eup %1409  ;;  %1427 = vrcp.f32 %v669_v39 }
 0x5b2   :  { %v1412_v38 = vpop.eup %1411  ;;  %v670_v41 = vadd.f32 1.0, %v1410_v37  ;;  %1429 = vpow2.f32 %v1370_v20  ;;  %v1368_v57 = vmul.f32 -1.442695, %v1247_v42  ;;  %v1369_v56 = vmul.f32 -1.442695, %v1248_v49 }
 0x5b3   :  { %v671_v46 = vadd.f32 1.0, %v1412_v38  ;;  %1431 = vpow2.f32 %v1371_v40 }
 0x5b4   :  { %1433 = vrcp.f32 %v670_v41  ;;  %v1473_v41 = vld [vmem:[#allocation2 + $0x40] sm:$0xff] }
 0x5b5   :  { %v1414_v53 = vpop.eup %1413  ;;  %1435 = vrcp.f32 %v671_v46  ;;  %v1474_v46 = vld [vmem:[#allocation2 + $0x48] sm:$0xff] }
 0x5b6   :  { %v1416_v54 = vpop.eup %1415  ;;  %v672_v55 = vadd.f32 1.0, %v1414_v53  ;;  %1437 = vpow2.f32 %v1366_v44 }
 0x5b7   :  { %v673_v59 = vadd.f32 1.0, %v1416_v54  ;;  %1439 = vpow2.f32 %v1367_v48 }
 0x5b8   :  { %1441 = vrcp.f32 %v672_v55  ;;  %v1475_v55 = vld [vmem:[#allocation2 + $0x70] sm:$0xff] }
 0x5b9   :  { %v1418_v58 = vpop.eup %1417  ;;  %1443 = vrcp.f32 %v673_v59 }
 0x5ba   :  { %v1420_v47 = vpop.eup %1419  ;;  %v690_v61 = vadd.f32 1.0, %v1418_v58  ;;  %1445 = vpow2.f32 %v1368_v57 }
 0x5bb   :  { %v1422_v62 = vpop.eup %1421  ;;  %v691_v1 = vadd.f32 1.0, %v1420_v47  ;;  %1447 = vpow2.f32 %v1369_v56  ;;  %v1476_v56 = vld [vmem:[#allocation2 + $0x78] sm:$0xff] }
 0x5bc   :  { %v1424_v6 = vpop.eup %1423  ;;  %v698_v43 = vmul.f32 %v1465_v4, %v690_v61  ;;  %v1275_v2 = vadd.f32 1.0, %v1422_v62 }
 0x5bd   :  { %v1426_v3 = vpop.eup %1425  ;;  %v699_v7 = vmul.f32 %v1466_v0, %v691_v1  ;;  %v1276_v8 = vadd.f32 1.0, %v1424_v6  ;;  %v1477_v1 = vld [vmem:[#allocation2 + $0x50] sm:$0xff] }
 0x5be   :  { %v1428_v9 = vpop.eup %1427  ;;  %706 = vst [vmem:[#allocation7] sm:$0xff] %v698_v43  ;;  %v692_v13 = vadd.f32 1.0, %v1426_v3  ;;  %1449 = vrcp.f32 %v1275_v2  ;;  %v1478_v43 = vld [vmem:[#allocation2 + $0x58] sm:$0xff] }
 0x5bf   :  { %v1430_v16 = vpop.eup %1429  ;;  %707 = vst [vmem:[#allocation7 + $0x8] sm:$0xff] %v699_v7  ;;  %v693_v17 = vadd.f32 1.0, %v1428_v9  ;;  %1451 = vrcp.f32 %v1276_v8  ;;  %v1479_v8 = vld [vmem:[#allocation2 + $0x60] sm:$0xff] }
 0x5c0   :  { %v1432_v31 = vpop.eup %1431  ;;  %v700_v12 = vmul.f32 %v1467_v11, %v692_v13  ;;  %v1281_v10 = vadd.f32 1.0, %v1430_v16  ;;  %v1480_v13 = vld [vmem:[#allocation2 + $0x68] sm:$0xff] }
 0x5c1   :  { %v1434_v45 = vpop.eup %1433  ;;  %v701_v5 = vmul.f32 %v1468_v52, %v693_v17  ;;  %v1282_v51 = vadd.f32 1.0, %v1432_v31 }
 0x5c2   :  { %v1436_v15 = vpop.eup %1435  ;;  %708 = vst [vmem:[#allocation7 + $0x10] sm:$0xff] %v700_v12  ;;  %v694_v30 = vadd.f32 1.0, %v1434_v45  ;;  %1453 = vrcp.f32 %v1281_v10 }
 0x5c3   :  { %v1438_v14 = vpop.eup %1437  ;;  %709 = vst [vmem:[#allocation7 + $0x18] sm:$0xff] %v701_v5  ;;  %v695_v19 = vadd.f32 1.0, %v1436_v15  ;;  %1455 = vrcp.f32 %v1282_v51 }
 0x5c4   :  { %v1440_v22 = vpop.eup %1439  ;;  %v702_v27 = vmul.f32 %v1469_v33, %v694_v30  ;;  %v1277_v50 = vadd.f32 1.0, %v1438_v14 }
 0x5c5   :  { %v1442_v36 = vpop.eup %1441  ;;  %v703_v28 = vmul.f32 %v1470_v23, %v695_v19  ;;  %v1278_v60 = vadd.f32 1.0, %v1440_v22 }
 0x5c6   :  { %v1444_v25 = vpop.eup %1443  ;;  %710 = vst [vmem:[#allocation7 + $0x20] sm:$0xff] %v702_v27  ;;  %v696_v63 = vadd.f32 1.0, %v1442_v36  ;;  %1457 = vrcp.f32 %v1277_v50 }
 0x5c7   :  { %v1446_v29 = vpop.eup %1445  ;;  %711 = vst [vmem:[#allocation7 + $0x28] sm:$0xff] %v703_v28  ;;  %v697_v34 = vadd.f32 1.0, %v1444_v25  ;;  %1459 = vrcp.f32 %v1278_v60 }
 0x5c8   :  { %v1448_v24 = vpop.eup %1447  ;;  %v704_v21 = vmul.f32 %v1471_v18, %v696_v63  ;;  %v1279_v20 = vadd.f32 1.0, %v1446_v29 }
 0x5c9   :  { %v705_v39 = vmul.f32 %v1472_v35, %v697_v34  ;;  %v1280_v40 = vadd.f32 1.0, %v1448_v24 }
 0x5ca   :  { %712 = vst [vmem:[#allocation7 + $0x30] sm:$0xff] %v704_v21  ;;  %1461 = vrcp.f32 %v1279_v20 }
 0x5cb   :  { %v1450_v32 = vpop.eup %1449  ;;  %713 = vst [vmem:[#allocation7 + $0x38] sm:$0xff] %v705_v39  ;;  %1463 = vrcp.f32 %v1280_v40 }
 0x5cc   :  { %v1452_v26 = vpop.eup %1451  ;;  %v1299_v37 = vadd.f32 1.0, %v1450_v32 }
 0x5cd   :  { %v1300_v38 = vadd.f32 1.0, %v1452_v26 }
 0x5ce   :  { %v1307_v44 = vmul.f32 %v1473_v41, %v1299_v37 }
 0x5cf   :  { %v1454_v42 = vpop.eup %1453  ;;  %v1308_v48 = vmul.f32 %v1474_v46, %v1300_v38 }
 0x5d0   :  { %v1456_v49 = vpop.eup %1455  ;;  %1316 = vst [vmem:[#allocation7 + $0x40] sm:$0xff] %v1307_v44  ;;  %v1305_v53 = vadd.f32 1.0, %v1454_v42 }
 0x5d1   :  { %1317 = vst [vmem:[#allocation7 + $0x48] sm:$0xff] %v1308_v48  ;;  %v1306_v54 = vadd.f32 1.0, %v1456_v49 }
 0x5d2   :  { %v1313_v57 = vmul.f32 %v1475_v55, %v1305_v53 }
 0x5d3   :  { %v1458_v59 = vpop.eup %1457  ;;  %v1314_v58 = vmul.f32 %v1476_v56, %v1306_v54 }
 0x5d4   :  { %v1460_v47 = vpop.eup %1459  ;;  %1322 = vst [vmem:[#allocation7 + $0x70] sm:$0xff] %v1313_v57  ;;  %v1301_v61 = vadd.f32 1.0, %v1458_v59 }
 0x5d5   :  { %1323 = vst [vmem:[#allocation7 + $0x78] sm:$0xff] %v1314_v58  ;;  %v1302_v62 = vadd.f32 1.0, %v1460_v47 }
 0x5d6   :  { %v1309_v6 = vmul.f32 %v1477_v1, %v1301_v61 }
 0x5d7   :  { %v1462_v4 = vpop.eup %1461  ;;  %v1310_v2 = vmul.f32 %v1478_v43, %v1302_v62 }
 0x5d8   :  { %v1464_v3 = vpop.eup %1463  ;;  %1318 = vst [vmem:[#allocation7 + $0x50] sm:$0xff] %v1309_v6  ;;  %v1303_v0 = vadd.f32 1.0, %v1462_v4 }
 0x5d9   :  { %1319 = vst [vmem:[#allocation7 + $0x58] sm:$0xff] %v1310_v2  ;;  %v1304_v7 = vadd.f32 1.0, %v1464_v3 }
 0x5da   :  { %v1311_v9 = vmul.f32 %v1479_v8, %v1303_v0 }
 0x5db   :  { %v1312_v16 = vmul.f32 %v1480_v13, %v1304_v7 }
 0x5dc   :  { %1320 = vst [vmem:[#allocation7 + $0x60] sm:$0xff] %v1311_v9 }
 0x5dd   :  { %1321 = vst [vmem:[#allocation7 + $0x68] sm:$0xff] %v1312_v16 }
 0x5de   :  { %1532 = shalt.err (!%p1529_p0)
}
 0x5df   :  { %1335 = dma.vmem_to_hbm [thread:$0]  %s1330_s20, 2048, %s2080_s4, [#allocation4], %s1548_s18, %s1548_s18, %s1549_s19  }
 0x5e0   :  { %1545 = dma.done.wait [#allocation4], 2048  }
 0x5e1   :  { %1546 = vsyncadd [#allocation4], 4294965248 }
 0x5e2   :  { %1339 = vsyncpa [#allocation3], 1 }
 0x5e3   :  { %1340 = vsyncpa [#allocation6], 1 }
 0x5e4   :  { %1341 = vsyncpa [#allocation4], 1 }

</bundles_post_ra>
